<compile_context>
chip_gen: v5e
topology: v5e:2x2
jax: 0.10.0
libtpu: 0.0.40
codegen_flags: <defaults>
</compile_context>

<pallas_src>
import math

import jax
import jax.numpy as jnp
from jax.experimental import pallas as pl
from jax.experimental.pallas import tpu as pltpu


C_PAD = 128  # lane-dense channel padding (both Cs and Ct padded to 128)


# -----------------------------------------------------------------------------
# Pallas kernel: fused 1x1-conv connector + BatchNorm + distillation loss,
# all feature levels in one call (grid axis = level, "parallel").
# -----------------------------------------------------------------------------
def _fused_distill_kernel(rows_ref,                       # scalar prefetch (SMEM)
                          s_ref, t_ref, w_ref,            # bf16 inputs
                          scale_ref, shift_ref, margin_ref,  # f32 per-channel
                          out_ref):                       # (1,1,C_PAD) f32 partial
    i = pl.program_id(0)

    s = s_ref[0]                                           # (R_pad, C_PAD) bf16
    w = w_ref[0]                                           # (C_PAD, C_PAD) bf16
    # 1x1 conv (no bias) == matmul over channels; bf16 x bf16 -> f32 on MXU.
    conv = jnp.dot(s, w, preferred_element_type=jnp.float32)
    # BatchNorm2d (eval-mode affine, folded into per-channel scale/shift), f32.
    src = conv * scale_ref[0] + shift_ref[0]               # (R_pad, C_PAD)

    t = t_ref[0].astype(jnp.float32)                       # (R_pad, C_PAD)
    # distillation_loss: target = max(teacher, margin); masked squared error.
    tgt = jnp.maximum(t, margin_ref[0])
    diff = src - tgt
    keep = (src > tgt) | (tgt > 0.0)

    # Mask out rows that are padding for this level (per-level valid row count
    # comes in through scalar prefetch -> SMEM).
    row_ids = jax.lax.broadcasted_iota(jnp.int32, src.shape, 0)
    valid = row_ids < rows_ref[i]

    masked = jnp.where(keep & valid, diff * diff, 0.0)
    # Per-channel partial sum only (sublane reduce, lane-dense single write);
    # the cross-lane reduce and the 1/2^(L-1-i) weighting are done in JAX.
    out_ref[0] = jnp.sum(masked, axis=0, keepdims=True)


def fused_connector_distill_loss(s2d_list, t2d_list, conn_ws, bn_scales,
                                 bn_shifts, margins):
    """One pallas_call computing the weighted distillation loss of all levels."""
    n_levels = len(s2d_list)
    r_pad = max(a.shape[0] for a in s2d_list)
    r_pad = ((r_pad + 7) // 8) * 8                        # sublane-friendly

    def pad2(a, rp, cp, dtype):
        r, c = a.shape
        return jnp.zeros((rp, cp), dtype).at[:r, :c].set(a.astype(dtype))

    # Stack all levels into lane-dense, row-padded slabs.
    s_p = jnp.stack([pad2(a, r_pad, C_PAD, jnp.bfloat16) for a in s2d_list])
    t_p = jnp.stack([pad2(a, r_pad, C_PAD, jnp.bfloat16) for a in t2d_list])
    w_p = jnp.stack([pad2(w, C_PAD, C_PAD, jnp.bfloat16) for w in conn_ws])
    sc_p = jnp.stack([pad2(s, 1, C_PAD, jnp.float32) for s in bn_scales])
    sh_p = jnp.stack([pad2(s, 1, C_PAD, jnp.float32) for s in bn_shifts])
    mg_p = jnp.stack([pad2(m, 1, C_PAD, jnp.float32) for m in margins])
    row_counts = jnp.array([a.shape[0] for a in s2d_list], jnp.int32)

    partials = pl.pallas_call(
        _fused_distill_kernel,
        out_shape=jax.ShapeDtypeStruct((n_levels, 1, C_PAD), jnp.float32),
        grid_spec=pltpu.PrefetchScalarGridSpec(
            num_scalar_prefetch=1,
            grid=(n_levels,),
            in_specs=[
                pl.BlockSpec((1, r_pad, C_PAD), lambda i, rows: (i, 0, 0)),
                pl.BlockSpec((1, r_pad, C_PAD), lambda i, rows: (i, 0, 0)),
                pl.BlockSpec((1, C_PAD, C_PAD), lambda i, rows: (i, 0, 0)),
                pl.BlockSpec((1, 1, C_PAD), lambda i, rows: (i, 0, 0)),
                pl.BlockSpec((1, 1, C_PAD), lambda i, rows: (i, 0, 0)),
                pl.BlockSpec((1, 1, C_PAD), lambda i, rows: (i, 0, 0)),
            ],
            out_specs=pl.BlockSpec((1, 1, C_PAD), lambda i, rows: (i, 0, 0)),
        ),
        compiler_params=pltpu.CompilerParams(
            dimension_semantics=("parallel",),
            vmem_limit_bytes=32 * 1024 * 1024),
    )(row_counts, s_p, t_p, w_p, sc_p, sh_p, mg_p)

    weights = jnp.array([1.0 / (2 ** (n_levels - 1 - i))
                         for i in range(n_levels)], jnp.float32)
    return jnp.sum(partials * weights[:, None, None])


# -----------------------------------------------------------------------------
# Plain-JAX glue: margins, layout conversion, synthetic backbones
# -----------------------------------------------------------------------------
def _norm_cdf(x):
    return 0.5 * (1.0 + jax.scipy.special.erf(x / math.sqrt(2.0)))


def get_margin_from_bn(bn_weight, bn_bias):
    """Vectorized get_margin_from_BN (host-side parameter setup)."""
    s = jnp.abs(bn_weight)
    m = bn_bias
    cdf = _norm_cdf(-m / s)
    safe_cdf = jnp.where(cdf > 0.001, cdf, 1.0)
    margin_a = -s * jnp.exp(-(m / s) ** 2 / 2.0) / math.sqrt(2.0 * math.pi) \
               / safe_cdf + m
    margin_b = -3.0 * s
    return jnp.where(cdf > 0.001, margin_a, margin_b)


def nchw_to_2d(x):
    n, c, h, w = x.shape
    return jnp.transpose(x, (0, 2, 3, 1)).reshape(n * h * w, c)


def extract_feature(x_nchw, proj_ws, head_w):
    """Synthetic backbone: level i halves spatial (i>0) and projects channels."""
    feats = []
    cur = x_nchw
    for i, pw in enumerate(proj_ws):
        if i > 0:
            cur = jax.lax.reduce_window(cur, 0.0, jax.lax.add,
                                        (1, 1, 2, 2), (1, 1, 2, 2),
                                        'VALID') / 4.0
        f = jnp.einsum('oc,nchw->nohw', pw, cur)
        f = jax.nn.relu(f)
        feats.append(f)
        cur = f
    pooled = jnp.mean(feats[-1], axis=(2, 3))      # (N, C_last)
    out = pooled @ head_w                          # (N, num_classes)
    return feats, out


def distiller_forward(params, x):
    """Distiller.forward with x_NT='none', mask='none'."""
    t_feats, _t_out = extract_feature(x, params['t_proj'], params['t_head'])
    s_feats, s_out = extract_feature(x, params['s_proj'], params['s_head'])
    s2d = [nchw_to_2d(f) for f in s_feats]
    t2d = [nchw_to_2d(f) for f in t_feats]          # .detach() -> value-only
    loss_distill = fused_connector_distill_loss(
        s2d, t2d, params['conn_w'], params['bn_scale'], params['bn_shift'],
        params['margin'])
    return s_out, loss_distill


# Pure-JAX reference of the same math.  Inputs are quantized to bf16 exactly as
# in the kernel path (a deliberate precision/performance choice), so the
# comparison isolates kernel correctness with a tight tolerance.
def _ref_level_loss(s2d, t2d, w, scale, shift, margin):
    s = s2d.astype(jnp.bfloat16).astype(jnp.float32)
    t = t2d.astype(jnp.bfloat16).astype(jnp.float32)
    wq = w.astype(jnp.bfloat16).astype(jnp.float32)
    src = (s @ wq) * scale + shift
    tgt = jnp.maximum(t, margin)
    keep = ((src > tgt) | (tgt > 0.0)).astype(jnp.float32)
    return jnp.sum((src - tgt) ** 2 * keep)


def distiller_forward_ref(params, x):
    t_feats, _ = extract_feature(x, params['t_proj'], params['t_head'])
    s_feats, s_out = extract_feature(x, params['s_proj'], params['s_head'])
    feat_num = len(t_feats)
    loss = jnp.float32(0.0)
    for i in range(feat_num):
        li = _ref_level_loss(nchw_to_2d(s_feats[i]), nchw_to_2d(t_feats[i]),
                             params['conn_w'][i], params['bn_scale'][i],
                             params['bn_shift'][i], params['margin'][i])
        loss = loss + li / (2 ** (feat_num - i - 1))
    return s_out, loss


# -----------------------------------------------------------------------------
# Deterministic parameter construction (synthetic, no checkpoints)
# -----------------------------------------------------------------------------
def build_params(key, in_ch, t_channels, s_channels, num_classes):
    n_levels = len(t_channels)
    num_keys = len(t_channels) + len(s_channels) + 2 + 3 * n_levels
    kit = iter(jax.random.split(key, num_keys))

    def proj_stack(channels):
        ws, prev = [], in_ch
        for c in channels:
            ws.append(0.3 * jax.random.normal(next(kit), (c, prev), jnp.float32))
            prev = c
        return ws

    t_proj = proj_stack(t_channels)
    s_proj = proj_stack(s_channels)
    t_head = 0.1 * jax.random.normal(next(kit), (t_channels[-1], num_classes),
                                     jnp.float32)
    s_head = 0.1 * jax.random.normal(next(kit), (s_channels[-1], num_classes),
                                     jnp.float32)

    conn_w, bn_scale, bn_shift, margins = [], [], [], []
    eps = 1e-5
    for tc, sc in zip(t_channels, s_channels):
        # Conv2d(sc, tc, 1x1, bias=False), init normal(0, sqrt(2/(1*1*tc)));
        # stored as (Cs, Ct) for the channels-last matmul.
        w = jax.random.normal(next(kit), (sc, tc), jnp.float32) \
            * math.sqrt(2.0 / tc)
        conn_w.append(w)
        # BatchNorm2d(tc) eval-mode: gamma=1, beta=0, running_mean=0, var=1.
        bn_scale.append(jnp.full((1, tc), 1.0 / math.sqrt(1.0 + eps),
                                 jnp.float32))
        bn_shift.append(jnp.zeros((1, tc), jnp.float32))
        # Synthetic teacher BN-before-relu stats -> per-channel margin.
        bn_w = 0.5 + jax.random.uniform(next(kit), (tc,), jnp.float32)
        bn_b = 0.5 * jax.random.normal(next(kit), (tc,), jnp.float32)
        margins.append(get_margin_from_bn(bn_w, bn_b).reshape(1, tc))

    return {
        't_proj': t_proj, 's_proj': s_proj,
        't_head': t_head, 's_head': s_head,
        'conn_w': conn_w, 'bn_scale': bn_scale, 'bn_shift': bn_shift,
        'margin': margins,
    }


# -----------------------------------------------------------------------------
if __name__ == "__main__":
    key = jax.random.PRNGKey(0)
    k_param, k_x = jax.random.split(key)

    N, C_in, H, W = 2, 3, 16, 16
    t_channels = [8, 16, 32, 64]
    s_channels = [4, 8, 16, 32]
    num_classes = 10

    params = build_params(k_param, C_in, t_channels, s_channels, num_classes)
    x = jax.random.normal(k_x, (N, C_in, H, W), jnp.float32)   # NCHW like torch

    fwd = jax.jit(distiller_forward)
    s_out, loss_distill = fwd(params, x)
    s_out = jax.block_until_ready(s_out)
    loss_distill = jax.block_until_ready(loss_distill)

    # Correctness check against a pure-JAX reference of the same math.
    s_out_ref, loss_ref = jax.jit(distiller_forward_ref)(params, x)
    loss_ref = jax.block_until_ready(loss_ref)
    assert s_out.shape == (N, num_classes)
    assert jnp.allclose(loss_distill, loss_ref, rtol=2e-3, atol=1e-2), \
        (float(loss_distill), float(loss_ref))

    print("KERNEL_OK")
</pallas_src>

<mosaic_0001>
module attributes {stable_mosaic.version = 11 : i64} {
  func.func @_fused_distill_kernel(%arg0: i32, %arg1: memref<4xi32, #tpu.memory_space<smem>>, %arg2: memref<1x512x128xbf16, #tpu.memory_space<vmem>>, %arg3: memref<1x512x128xbf16, #tpu.memory_space<vmem>>, %arg4: memref<1x128x128xbf16, #tpu.memory_space<vmem>>, %arg5: memref<1x1x128xf32, #tpu.memory_space<vmem>>, %arg6: memref<1x1x128xf32, #tpu.memory_space<vmem>>, %arg7: memref<1x1x128xf32, #tpu.memory_space<vmem>>, %arg8: memref<1x1x128xf32, #tpu.memory_space<vmem>>) attributes {dimension_semantics = [#tpu.dimension_semantics<parallel>], iteration_bounds = array<i64: 4>, scalar_prefetch = 1 : i64, scratch_operands = 0 : i64, tpu.core_type = #tpu.core_type<tc>, window_params = [{transform_indices = @transform_0, window_bounds = array<i64: 1, 512, 128>}, {transform_indices = @transform_1, window_bounds = array<i64: 1, 512, 128>}, {transform_indices = @transform_2, window_bounds = array<i64: 1, 128, 128>}, {transform_indices = @transform_3, window_bounds = array<i64: 1, 1, 128>}, {transform_indices = @transform_4, window_bounds = array<i64: 1, 1, 128>}, {transform_indices = @transform_5, window_bounds = array<i64: 1, 1, 128>}, {transform_indices = @transform_6, window_bounds = array<i64: 1, 1, 128>}]} {
    %c0 = arith.constant 0 : index
    %c0_0 = arith.constant 0 : index
    %c0_1 = arith.constant 0 : index
    %0 = vector.load %arg2[%c0, %c0_0, %c0_1] : memref<1x512x128xbf16, #tpu.memory_space<vmem>>, vector<1x512x128xbf16>
    %1 = vector.shape_cast %0 : vector<1x512x128xbf16> to vector<512x128xbf16>
    %c0_2 = arith.constant 0 : index
    %c0_3 = arith.constant 0 : index
    %c0_4 = arith.constant 0 : index
    %2 = vector.load %arg4[%c0_2, %c0_3, %c0_4] : memref<1x128x128xbf16, #tpu.memory_space<vmem>>, vector<1x128x128xbf16>
    %3 = vector.shape_cast %2 : vector<1x128x128xbf16> to vector<128x128xbf16>
    %cst = arith.constant dense<0.000000e+00> : vector<512x128xf32>
    %4 = tpu.matmul %1, %3, %cst {dimension_numbers = #tpu.dot_dimension_numbers<[1], [0], [0], [1], [0, 0, 1, 1], [], []>} : vector<512x128xbf16>, vector<128x128xbf16>, vector<512x128xf32> -> vector<512x128xf32>
    %c0_5 = arith.constant 0 : index
    %c0_6 = arith.constant 0 : index
    %c0_7 = arith.constant 0 : index
    %5 = vector.load %arg5[%c0_5, %c0_6, %c0_7] : memref<1x1x128xf32, #tpu.memory_space<vmem>>, vector<1x1x128xf32>
    %6 = vector.shape_cast %5 : vector<1x1x128xf32> to vector<1x128xf32>
    %7 = vector.broadcast %6 : vector<1x128xf32> to vector<512x128xf32>
    %8 = arith.mulf %4, %7 : vector<512x128xf32>
    %c0_8 = arith.constant 0 : index
    %c0_9 = arith.constant 0 : index
    %c0_10 = arith.constant 0 : index
    %9 = vector.load %arg6[%c0_8, %c0_9, %c0_10] : memref<1x1x128xf32, #tpu.memory_space<vmem>>, vector<1x1x128xf32>
    %10 = vector.shape_cast %9 : vector<1x1x128xf32> to vector<1x128xf32>
    %11 = vector.broadcast %10 : vector<1x128xf32> to vector<512x128xf32>
    %12 = arith.addf %8, %11 : vector<512x128xf32>
    %c0_11 = arith.constant 0 : index
    %c0_12 = arith.constant 0 : index
    %c0_13 = arith.constant 0 : index
    %13 = vector.load %arg3[%c0_11, %c0_12, %c0_13] : memref<1x512x128xbf16, #tpu.memory_space<vmem>>, vector<1x512x128xbf16>
    %14 = vector.shape_cast %13 : vector<1x512x128xbf16> to vector<512x128xbf16>
    %15 = arith.extf %14 : vector<512x128xbf16> to vector<512x128xf32>
    %c0_14 = arith.constant 0 : index
    %c0_15 = arith.constant 0 : index
    %c0_16 = arith.constant 0 : index
    %16 = vector.load %arg7[%c0_14, %c0_15, %c0_16] : memref<1x1x128xf32, #tpu.memory_space<vmem>>, vector<1x1x128xf32>
    %17 = vector.shape_cast %16 : vector<1x1x128xf32> to vector<1x128xf32>
    %18 = vector.broadcast %17 : vector<1x128xf32> to vector<512x128xf32>
    %19 = arith.maximumf %15, %18 : vector<512x128xf32>
    %20 = arith.subf %12, %19 : vector<512x128xf32>
    %21 = arith.cmpf ogt, %12, %19 : vector<512x128xf32>
    %cst_17 = arith.constant 0.000000e+00 : f32
    %22 = vector.broadcast %cst_17 : f32 to vector<512x128xf32>
    %23 = arith.cmpf ogt, %19, %22 : vector<512x128xf32>
    %24 = arith.ori %21, %23 : vector<512x128xi1>
    %25 = tpu.iota {dimensions = array<i32: 0>} : vector<512x128xi32>
    %26 = arith.index_cast %arg0 : i32 to index
    %27 = memref.load %arg1[%26] : memref<4xi32, #tpu.memory_space<smem>>
    %28 = vector.broadcast %27 : i32 to vector<512x128xi32>
    %29 = arith.cmpi slt, %25, %28 : vector<512x128xi32>
    %30 = arith.andi %24, %29 : vector<512x128xi1>
    %31 = arith.mulf %20, %20 : vector<512x128xf32>
    %cst_18 = arith.constant 0.000000e+00 : f32
    %32 = vector.broadcast %cst_18 : f32 to vector<512x128xf32>
    %33 = arith.select %30, %31, %32 : vector<512x128xi1>, vector<512x128xf32>
    %cst_19 = arith.constant dense<0.000000e+00> : vector<128xf32>
    %34 = vector.multi_reduction <add>, %33, %cst_19 [0] : vector<512x128xf32> to vector<128xf32>
    %35 = vector.shape_cast %34 : vector<128xf32> to vector<1x128xf32>
    %c0_20 = arith.constant 0 : index
    %c0_21 = arith.constant 0 : index
    %c0_22 = arith.constant 0 : index
    %36 = vector.load %arg8[%c0_20, %c0_21, %c0_22] : memref<1x1x128xf32, #tpu.memory_space<vmem>>, vector<1x1x128xf32>
    %37 = vector.shape_cast %36 : vector<1x1x128xf32> to vector<1x128xf32>
    %38 = vector.shape_cast %35 : vector<1x128xf32> to vector<1x1x128xf32>
    tpu.vector_store %arg8[%c0_20, %c0_21, %c0_22], %38 {strides = array<i32>} : memref<1x1x128xf32, #tpu.memory_space<vmem>>, vector<1x1x128xf32>,
    return
  }
  func.func @transform_0(%arg0: i32, %arg1: memref<4xi32, #tpu.memory_space<smem>>) -> (i32, i32, i32) {
    %c0_i32 = arith.constant 0 : i32
    %c0_i32_0 = arith.constant 0 : i32
    %c0_i32_1 = arith.constant 0 : i32
    return %arg0, %c0_i32, %c0_i32_0 : i32, i32, i32
  }
  func.func @transform_1(%arg0: i32, %arg1: memref<4xi32, #tpu.memory_space<smem>>) -> (i32, i32, i32) {
    %c0_i32 = arith.constant 0 : i32
    %c0_i32_0 = arith.constant 0 : i32
    %c0_i32_1 = arith.constant 0 : i32
    return %arg0, %c0_i32, %c0_i32_0 : i32, i32, i32
  }
  func.func @transform_2(%arg0: i32, %arg1: memref<4xi32, #tpu.memory_space<smem>>) -> (i32, i32, i32) {
    %c0_i32 = arith.constant 0 : i32
    %c0_i32_0 = arith.constant 0 : i32
    %c0_i32_1 = arith.constant 0 : i32
    return %arg0, %c0_i32, %c0_i32_0 : i32, i32, i32
  }
  func.func @transform_3(%arg0: i32, %arg1: memref<4xi32, #tpu.memory_space<smem>>) -> (i32, i32, i32) {
    %c0_i32 = arith.constant 0 : i32
    %c0_i32_0 = arith.constant 0 : i32
    %c0_i32_1 = arith.constant 0 : i32
    return %arg0, %c0_i32, %c0_i32_0 : i32, i32, i32
  }
  func.func @transform_4(%arg0: i32, %arg1: memref<4xi32, #tpu.memory_space<smem>>) -> (i32, i32, i32) {
    %c0_i32 = arith.constant 0 : i32
    %c0_i32_0 = arith.constant 0 : i32
    %c0_i32_1 = arith.constant 0 : i32
    return %arg0, %c0_i32, %c0_i32_0 : i32, i32, i32
  }
  func.func @transform_5(%arg0: i32, %arg1: memref<4xi32, #tpu.memory_space<smem>>) -> (i32, i32, i32) {
    %c0_i32 = arith.constant 0 : i32
    %c0_i32_0 = arith.constant 0 : i32
    %c0_i32_1 = arith.constant 0 : i32
    return %arg0, %c0_i32, %c0_i32_0 : i32, i32, i32
  }
  func.func @transform_6(%arg0: i32, %arg1: memref<4xi32, #tpu.memory_space<smem>>) -> (i32, i32, i32) {
    %c0_i32 = arith.constant 0 : i32
    %c0_i32_0 = arith.constant 0 : i32
    %c0_i32_1 = arith.constant 0 : i32
    return %arg0, %c0_i32, %c0_i32_0 : i32, i32, i32
  }
}

</mosaic_0001>

<bundles_post_ra>
// kernel: distiller_forward.1
= control target key start
LH: loop header
LB: loop body
LE: loop exit
PB: predicated region body
PF: predicated region fallthrough
CT: control target
= control target key end

     0   :  { %s2343_s27 = smov [#allocation3]   ;;  %s4364_s0 = inlined_call_operand.vmem [shape: s32[4], index: 0, kind: input, shape index: {}]   ;;  %s4365_s1 = inlined_call_operand.vmem [shape: bf16[4,512,128], index: 1, kind: input, shape index: {}]   ;;  %s4366_s2 = inlined_call_operand.vmem [shape: bf16[4,512,128], index: 2, kind: input, shape index: {}]   ;;  %s4367_s3 = inlined_call_operand.vmem [shape: bf16[4,128,128], index: 3, kind: input, shape index: {}]   ;;  %s4368_s4 = inlined_call_operand.vmem [shape: f32[4,1,128], index: 4, kind: input, shape index: {}]   ;;  %s4369_s5 = inlined_call_operand.vmem [shape: f32[4,1,128], index: 5, kind: input, shape index: {}]   ;;  %s4370_s6 = inlined_call_operand.vmem [shape: f32[4,1,128], index: 6, kind: input, shape index: {}]   ;;  %s4371_s7 = inlined_call_operand.vmem [shape: f32[4,1,128], index: 7, kind: output, shape index: {}]  }
   0x1   :  { %s13_s26 = sshll.u32 %s4364_s0, 4  ;;  %s14_s26 = int_to_ptr.vmem [resolvable:$true] %s13_s26 }
   0x2   :  { %16 = dma.vmem_to_smem %s14_s26, 16, %s2343_s27, [#allocation2] }
   0x3   :  { %2337 = dma.done.wait [#allocation2], 16 }
   0x4   :  { %2338 = vsyncadd [#allocation2], 4294967280 }
   0x5   :  { %19 = sfence }
   0x6   :  { %s2387_s28 = smov 0  }
   0x7 LB: > { %s2393_s29 = sadd.s32 4294967295, %s2341_s28   ;;  %p1911_p0 = scmp.ge.s32.totalorder %s2341_s28, 1  ;;  %s2341_s28 = sphi %s2387_s28, %s25_s28  }
   0x8   : > { %p265_p1 = scmp.lt.s32.totalorder %s2341_s28, 5 }
   0xa   : > { %p266_p2 = pnand %p1911_p0, %p265_p1 }
   0xc   : > { %269 = sbr.rel (%p266_p2) target bundleno = 428 (0x1ac), region = 44 }
  0x11   : > { %p312_p3 = scmp.lt.s32.totalorder %s2393_s29, 3  ;;  %s1481_s27 = sld [smem:[#allocation3 + %s2393_s29]]  ;;  %v1416_v44 = vlaneseq }
  0x13   : > { %s2399_s0 = scalar_select %p312_p3, %s2393_s29, 3  ;;  %v2494_v50 = vshrl.u32 %v1416_v44, 7 }
  0x15   : > { %s2082_s30 = sshll.u32 %s2399_s0, 6  ;;  %s2416_s13 = scalar_lea.vmem %s4368_s4, %s2399_s0  ;;  %v1418_v54 = vadd.s32 8, %v2494_v50 }
  0x16   : > { %s2405_s10 = scalar_lea.vmem %s4367_s3, %s2082_s30  ;;  %s2423_s16 = scalar_lea.vmem %s4369_s5, %s2399_s0  ;;  %v2478_v37 = vld [vmem:[%s2416_s13] ss:$0 sm:$0xff] }
  0x17   : > { %v2122_v0 = vld [vmem:[%s2405_s10 + $0x38] sm:$0xff]  ;;  %v2121_v1 = vld [vmem:[%s2405_s10 + $0x30] sm:$0xff]  ;;  %v2120_v2 = vld [vmem:[%s2405_s10 + $0x28] sm:$0xff]  ;;  %s2429_s19 = scalar_lea.vmem %s4370_s6, %s2399_s0  ;;  %s2080_s20 = sshll.u32 %s2399_s0, 8  ;;  %v2496_v51 = vstv %s1481_s27 }
  0x18   : > { %659 = vmatpush.bf16.msra.mxu0 %v2122_v0  ;;  %2282 = vmatpush.bf16.msra.mxu1 %v2122_v0  ;;  %v2119_v3 = vld [vmem:[%s2405_s10 + $0x20] sm:$0xff]  ;;  %v2118_v4 = vld [vmem:[%s2405_s10 + $0x18] sm:$0xff]  ;;  %v2117_v5 = vld [vmem:[%s2405_s10 + $0x10] sm:$0xff]  ;;  %s2439_s23 = scalar_lea.vmem %s4365_s1, %s2080_s20  ;;  %s2474_s26 = scalar_lea.vmem %s4366_s2, %s2080_s20  ;;  %vm1483_vm3 = vcmp.lt.s32.totalorder %v2494_v50, %v2496_v51  ;;  %vm1484_vm5 = vcmp.lt.s32.totalorder %v1418_v54, %v2496_v51 }
  0x19   : > { %2283 = vmatpush.bf16.msra.mxu2 %v2122_v0  ;;  %2284 = vmatpush.bf16.msra.mxu3 %v2122_v0  ;;  %v2116_v6 = vld [vmem:[%s2405_s10 + $0x8] sm:$0xff]  ;;  %v2115_v7 = vld [vmem:[%s2405_s10] sm:$0xff]  ;;  %v2085_v13 = vld [vmem:[%s2439_s23 + $0x10] sm:$0xff]  ;;  %s338_s8 = scalar_lea.vmem %s4371_s7, %s2399_s0 }
  0x1a   : > { %v2083_v8 = vld [vmem:[%s2439_s23] sm:$0xff]  ;;  %v2084_v10 = vld [vmem:[%s2439_s23 + $0x8] sm:$0xff]  ;;  %v2093_v14 = vld [vmem:[%s2439_s23 + $0x50] sm:$0xff] }
  0x1b   : > { %v2091_v9 = vld [vmem:[%s2439_s23 + $0x40] sm:$0xff]  ;;  %v2092_v11 = vld [vmem:[%s2439_s23 + $0x48] sm:$0xff]  ;;  %v2086_v16 = vld [vmem:[%s2439_s23 + $0x18] sm:$0xff] }
  0x1c   : > { %660 = vmatpush.bf16.msra.mxu0 %v2121_v1  ;;  %2285 = vmatpush.bf16.msra.mxu1 %v2121_v1  ;;  %v2099_v12 = vld [vmem:[%s2439_s23 + $0x80] sm:$0xff]  ;;  %v2100_v15 = vld [vmem:[%s2439_s23 + $0x88] sm:$0xff]  ;;  %v2094_v17 = vld [vmem:[%s2439_s23 + $0x58] sm:$0xff] }
  0x1d   : > { %2286 = vmatpush.bf16.msra.mxu2 %v2121_v1  ;;  %2287 = vmatpush.bf16.msra.mxu3 %v2121_v1  ;;  %v2101_v18 = vld [vmem:[%s2439_s23 + $0x90] sm:$0xff]  ;;  %v2107_v19 = vld [vmem:[%s2439_s23 + $0xc0] sm:$0xff]  ;;  %v2102_v22 = vld [vmem:[%s2439_s23 + $0x98] sm:$0xff] }
  0x1e   : > { %v2087_v20 = vld [vmem:[%s2439_s23 + $0x20] sm:$0xff]  ;;  %v2108_v23 = vld [vmem:[%s2439_s23 + $0xc8] sm:$0xff]  ;;  %v2109_v27 = vld [vmem:[%s2439_s23 + $0xd0] sm:$0xff] }
  0x1f   : > { %v2095_v21 = vld [vmem:[%s2439_s23 + $0x60] sm:$0xff]  ;;  %v2088_v24 = vld [vmem:[%s2439_s23 + $0x28] sm:$0xff]  ;;  %v2089_v28 = vld [vmem:[%s2439_s23 + $0x30] sm:$0xff] }
  0x20   : > { %661 = vmatpush.bf16.msra.mxu0 %v2120_v2  ;;  %2288 = vmatpush.bf16.msra.mxu1 %v2120_v2  ;;  %v2096_v25 = vld [vmem:[%s2439_s23 + $0x68] sm:$0xff]  ;;  %v2103_v26 = vld [vmem:[%s2439_s23 + $0xa0] sm:$0xff]  ;;  %v2097_v29 = vld [vmem:[%s2439_s23 + $0x70] sm:$0xff] }
  0x21   : > { %2289 = vmatpush.bf16.msra.mxu2 %v2120_v2  ;;  %2290 = vmatpush.bf16.msra.mxu3 %v2120_v2  ;;  %v2104_v30 = vld [vmem:[%s2439_s23 + $0xa8] sm:$0xff]  ;;  %v2110_v31 = vld [vmem:[%s2439_s23 + $0xd8] sm:$0xff]  ;;  %v2105_v34 = vld [vmem:[%s2439_s23 + $0xb0] sm:$0xff]  ;;  %v1419_v2 = vadd.s32 16, %v2494_v50 }
  0x22   : > { %v2090_v32 = vld [vmem:[%s2439_s23 + $0x38] sm:$0xff]  ;;  %v2111_v35 = vld [vmem:[%s2439_s23 + $0xe0] sm:$0xff]  ;;  %v2112_v46 = vld [vmem:[%s2439_s23 + $0xe8] sm:$0xff] }
  0x23   : > { %v2098_v33 = vld [vmem:[%s2439_s23 + $0x78] sm:$0xff]  ;;  %v2124_v36 = vld [vmem:[%s2474_s26] sm:$0xff]   ;;  %v2251_v55 = vld [vmem:[%s2474_s26 + $0x8] sm:$0xff]   ;;  %vm1485_vm11 = vcmp.lt.s32.totalorder %v1419_v2, %v2496_v51 }
  0x24   : > { %662 = vmatpush.bf16.msra.mxu0 %v2119_v3  ;;  %2291 = vmatpush.bf16.msra.mxu1 %v2119_v3  ;;  %v2481_v38 = vld [vmem:[%s2423_s16] ss:$0 sm:$0xff]  ;;  %v2125_v39 = vunpack.c.l.bf16 %v2124_v36  ;;  %v2106_v45 = vld [vmem:[%s2439_s23 + $0xb8] sm:$0xff]  ;;  %v2126_v49 = vunpack.c.h.bf16 %v2124_v36  ;;  %v2129_v60 = vunpack.c.l.bf16 %v2251_v55 }
  0x25   : > { %2292 = vmatpush.bf16.msra.mxu2 %v2119_v3  ;;  %2293 = vmatpush.bf16.msra.mxu3 %v2119_v3  ;;  %v2484_v40 = vld [vmem:[%s2429_s19] ss:$0 sm:$0xff] }
  0x26   : > { %v1096_v48 = vmax.f32 %v2125_v39, %v2484_v40  ;;  %v1097_v52 = vmax.f32 %v2126_v49, %v2484_v40  ;;  %v1098_v0 = vmax.f32 %v2129_v60, %v2484_v40 }
  0x28   : > { %663 = vmatpush.bf16.msra.mxu0 %v2118_v4  ;;  %2294 = vmatpush.bf16.msra.mxu1 %v2118_v4  ;;  %vm1288_vm1 = vcmp.gt.f32.partialorder %v1096_v48, 0.0  ;;  %vm1289_vm4 = vcmp.gt.f32.partialorder %v1097_v52, 0.0  ;;  %vm1290_vm10 = vcmp.gt.f32.partialorder %v1098_v0, 0.0 }
  0x29   : > { %2295 = vmatpush.bf16.msra.mxu2 %v2118_v4  ;;  %2296 = vmatpush.bf16.msra.mxu3 %v2118_v4 }
  0x2c   : > { %664 = vmatpush.bf16.msra.mxu0 %v2117_v5  ;;  %2297 = vmatpush.bf16.msra.mxu1 %v2117_v5 }
  0x2d   : > { %2298 = vmatpush.bf16.msra.mxu2 %v2117_v5  ;;  %2299 = vmatpush.bf16.msra.mxu3 %v2117_v5 }
  0x30   : > { %665 = vmatpush.bf16.msra.mxu0 %v2116_v6  ;;  %2300 = vmatpush.bf16.msra.mxu1 %v2116_v6 }
  0x31   : > { %2301 = vmatpush.bf16.msra.mxu2 %v2116_v6  ;;  %2302 = vmatpush.bf16.msra.mxu3 %v2116_v6 }
  0x34   : > { %666 = vmatpush.bf16.msra.mxu0 %v2115_v7  ;;  %2303 = vmatpush.bf16.msra.mxu1 %v2115_v7 }
  0x35   : > { %2304 = vmatpush.bf16.msra.mxu2 %v2115_v7  ;;  %2305 = vmatpush.bf16.msra.mxu3 %v2115_v7 }
  0x37   : > { %667 = vmatmul.bf16.vlgmr.msra.gmra.mxu0 %v2083_v8  ;;  %707 = vmatmul.bf16.vlgmr.msra.gmra.mxu1 %v2091_v9  ;;  %v2113_v8 = vld [vmem:[%s2439_s23 + $0xf0] sm:$0xff] }
  0x38   : > { %747 = vmatmul.bf16.vlgmr.msra.gmra.mxu2 %v2099_v12  ;;  %787 = vmatmul.bf16.vlgmr.msra.gmra.mxu3 %v2107_v19 }
  0x47   : > { %672 = vmatmul.bf16.gmra.mxu0 %v2084_v10  ;;  %712 = vmatmul.bf16.gmra.mxu1 %v2092_v11  ;;  %v2130_v10 = vunpack.c.h.bf16 %v2251_v55 }
  0x48   : > { %752 = vmatmul.bf16.gmra.mxu2 %v2100_v15  ;;  %792 = vmatmul.bf16.gmra.mxu3 %v2108_v23 }
  0x57   : > { %677 = vmatmul.bf16.gmra.mxu0 %v2085_v13  ;;  %717 = vmatmul.bf16.gmra.mxu1 %v2093_v14  ;;  %v1099_v13 = vmax.f32 %v2130_v10, %v2484_v40 }
  0x58   : > { %757 = vmatmul.bf16.gmra.mxu2 %v2101_v18  ;;  %797 = vmatmul.bf16.gmra.mxu3 %v2109_v27 }
  0x59   : > { %vm1291_vm15 = vcmp.gt.f32.partialorder %v1099_v13, 0.0 }
  0x67   : > { %682 = vmatmul.bf16.gmra.mxu0 %v2086_v16  ;;  %722 = vmatmul.bf16.gmra.mxu1 %v2094_v17  ;;  %v1420_v16 = vadd.s32 24, %v2494_v50  ;;  %v2521_v17 = vld [vmem:[%s2474_s26 + $0x10] sm:$0xff]  }
  0x68   : > { %762 = vmatmul.bf16.gmra.mxu2 %v2102_v22  ;;  %802 = vmatmul.bf16.gmra.mxu3 %v2110_v31  ;;  %v2133_v23 = vunpack.c.l.bf16 %v2521_v17 }
  0x77   : > { %687 = vmatmul.bf16.gmra.mxu0 %v2087_v20  ;;  %727 = vmatmul.bf16.gmra.mxu1 %v2095_v21 }
  0x78   : > { %767 = vmatmul.bf16.gmra.mxu2 %v2103_v26  ;;  %807 = vmatmul.bf16.gmra.mxu3 %v2111_v35  ;;  %v1100_v26 = vmax.f32 %v2133_v23, %v2484_v40  ;;  %v4402_v23 = vmov 0 }
  0x87   : > { %692 = vmatmul.bf16.gmra.mxu0 %v2088_v24  ;;  %732 = vmatmul.bf16.gmra.mxu1 %v2096_v25 }
  0x88   : > { %772 = vmatmul.bf16.gmra.mxu2 %v2104_v30  ;;  %812 = vmatmul.bf16.gmra.mxu3 %v2112_v46 }
  0x97   : > { %697 = vmatmul.bf16.gmra.mxu0 %v2089_v28  ;;  %737 = vmatmul.bf16.gmra.mxu1 %v2097_v29  ;;  %v1421_v28 = vadd.s32 32, %v2494_v50 }
  0x98   : > { %777 = vmatmul.bf16.gmra.mxu2 %v2105_v34  ;;  %817 = vmatmul.bf16.gmra.mxu3 %v2113_v8  ;;  %v2114_v34 = vld [vmem:[%s2439_s23 + $0xf8] sm:$0xff] }
  0xa7   : > { %702 = vmatmul.bf16.gmra.mxu0 %v2090_v32  ;;  %742 = vmatmul.bf16.gmra.mxu1 %v2098_v33 }
  0xa8   : > { %782 = vmatmul.bf16.gmra.mxu2 %v2106_v45  ;;  %822 = vmatmul.bf16.gmra.mxu3 %v2114_v34 }
  0xb4   : > { %v668_v41 = vpop.f32.mrf.mxu0  ;;  %v2487_v42 = vpop.f32.mrf.mxu1 }
  0xb5   : > { %v832_v43 = vmul.f32 %v2478_v37, %v668_v41  ;;  %v2258_v41 = vld [vmem:[%s2474_s26 + $0x40] sm:$0xff]  }
  0xb6   : > { %v2158_v55 = vunpack.c.h.bf16 %v2258_v41 }
  0xb7   : > { %v900_v47 = vadd.f32 %v2481_v38, %v832_v43 }
  0xb8   : > { %v1113_v60 = vmax.f32 %v2158_v55, %v2484_v40 }
  0xb9   : > { %vm1224_vm0 = vcmp.gt.f32.partialorder %v900_v47, %v1096_v48  ;;  %v1160_v57 = vsub.f32 %v900_v47, %v1096_v48  ;;  %v848_v47 = vmul.f32 %v2478_v37, %v2487_v42  ;;  %v2157_v48 = vunpack.c.l.bf16 %v2258_v41 }
  0xba   : > { %vm1352_vm2 = vmor %vm1224_vm0, %vm1288_vm1  ;;  %vm1486_vm0 = vcmp.lt.s32.totalorder %v1420_v16, %v2496_v51  ;;  %v2260_v16 = vld [vmem:[%s2474_s26 + $0x50] sm:$0xff]  }
  0xbb   : > { %vm1547_vm6 = vmand %vm1352_vm2, %vm1483_vm3  ;;  %v1611_v61 = vmul.f32 %v1160_v57, %v1160_v57  ;;  %v2517_v14 = vpop.f32.mrf.mxu2  ;;  %v2568_v2 = vpop.f32.mrf.mxu3 }
  0xbc   : > { %v670_v53 = vpop.f32.mrf.mxu0  ;;  %v2501_v56 = vpop.f32.mrf.mxu1 }
  0xbd   : > { %v833_v58 = vmul.f32 %v2478_v37, %v670_v53  ;;  %v1675_v4 = vsel %vm1547_vm6, %v1611_v61, 0.0  ;;  %v1112_v53 = vmax.f32 %v2157_v48, %v2484_v40  ;;  %v849_v54 = vmul.f32 %v2478_v37, %v2501_v56 }
  0xbf   : > { %v901_v59 = vadd.f32 %v2481_v38, %v833_v58  ;;  %v2259_v58 = vld [vmem:[%s2474_s26 + $0x48] sm:$0xff]   ;;  %v917_v42 = vadd.f32 %v2481_v38, %v849_v54  ;;  %v4407_v54 = vmov 0 }
  0xc0   : > { %v2162_v10 = vunpack.c.h.bf16 %v2259_v58 }
  0xc1   : > { %v1161_v62 = vsub.f32 %v901_v59, %v1097_v52  ;;  %vm1225_vm7 = vcmp.gt.f32.partialorder %v901_v59, %v1097_v52  ;;  %v916_v52 = vadd.f32 %v2481_v38, %v848_v47  ;;  %v1433_v59 = vadd.s32 128, %v2494_v50 }
  0xc2   : > { %vm1353_vm8 = vmor %vm1225_vm7, %vm1289_vm4  ;;  %vm1292_vm4 = vcmp.gt.f32.partialorder %v1100_v26, 0.0 }
  0xc3   : > { %vm1548_vm9 = vmand %vm1353_vm8, %vm1484_vm5  ;;  %v1612_v63 = vmul.f32 %v1161_v62, %v1161_v62  ;;  %v2534_v32 = vpop.f32.mrf.mxu2  ;;  %vm1487_vm5 = vcmp.lt.s32.totalorder %v1421_v28, %v2496_v51  ;;  %v1176_v56 = vsub.f32 %v916_v52, %v1112_v53 }
  0xc4   : > { %v673_v1 = vpop.f32.mrf.mxu0  ;;  %v2510_v3 = vpop.f32.mrf.mxu1  ;;  %v865_v41 = vmul.f32 %v2478_v37, %v2534_v32 }
  0xc5   : > { %v1676_v5 = vsel %vm1548_vm9, %v1612_v63, 0.0  ;;  %v834_v6 = vmul.f32 %v2478_v37, %v673_v1  ;;  %vm1240_vm9 = vcmp.gt.f32.partialorder %v916_v52, %v1112_v53  ;;  %v850_v62 = vmul.f32 %v2478_v37, %v2510_v3 }
  0xc6   : > { %v1739_v7 = vadd.f32 %v1676_v5, %v1675_v4  ;;  %v2161_v63 = vunpack.c.l.bf16 %v2259_v58  ;;  %v1434_v1 = vadd.s32 136, %v2494_v50  ;;  %v1177_v4 = vsub.f32 %v917_v42, %v1113_v60 }
  0xc7   : > { %v902_v9 = vadd.f32 %v2481_v38, %v834_v6  ;;  %v918_v5 = vadd.f32 %v2481_v38, %v850_v62  ;;  %v2266_v6 = vld [vmem:[%s2474_s26 + $0x80] sm:$0xff]   ;;  %v1437_v52 = vadd.s32 160, %v2494_v50 }
  0xc8   : > { %v1114_v3 = vmax.f32 %v2161_v63, %v2484_v40  ;;  %v933_v63 = vadd.f32 %v2481_v38, %v865_v41 }
  0xc9   : > { %v1162_v11 = vsub.f32 %v902_v9, %v1098_v0  ;;  %vm1226_vm12 = vcmp.gt.f32.partialorder %v902_v9, %v1098_v0  ;;  %v2579_v9 = vmul.f32 %v1176_v56, %v1176_v56 }
  0xca   : > { %vm1354_vm13 = vmor %vm1226_vm12, %vm1290_vm10  ;;  %vm1304_vm10 = vcmp.gt.f32.partialorder %v1112_v53, 0.0  ;;  %vm1499_vm12 = vcmp.lt.s32.totalorder %v1433_v59, %v2496_v51  ;;  %v2638_v53 = vpop.f32.mrf.mxu3 }
  0xcb   : > { %vm1549_vm14 = vmand %vm1354_vm13, %vm1485_vm11  ;;  %v1613_v12 = vmul.f32 %v1162_v11, %v1162_v11  ;;  %v2548_v49 = vpop.f32.mrf.mxu2  ;;  %vm1241_vm13 = vcmp.gt.f32.partialorder %v917_v42, %v1113_v60  ;;  %v2582_v11 = vld [vmem:[%s2474_s26 + $0x18] sm:$0xff]   ;;  %v1449_v42 = vadd.s32 256, %v2494_v50 }
  0xcc   : > { %v675_v15 = vpop.f32.mrf.mxu0  ;;  %v2523_v18 = vpop.f32.mrf.mxu1  ;;  %vm1368_vm11 = vmor %vm1240_vm9, %vm1304_vm10  ;;  %v866_v41 = vmul.f32 %v2478_v37, %v2548_v49 }
  0xcd   : > { %v1677_v19 = vsel %vm1549_vm14, %v1613_v12, 0.0  ;;  %v835_v20 = vmul.f32 %v2478_v37, %v675_v15  ;;  %vm1305_vm14 = vcmp.gt.f32.partialorder %v1113_v60, 0.0  ;;  %v2134_v12 = vunpack.c.h.bf16 %v2521_v17 }
  0xce   : > { %v1740_v21 = vadd.f32 %v1739_v7, %v1677_v19  ;;  %v1435_v15 = vadd.s32 144, %v2494_v50  ;;  %v864_v19 = vmul.f32 %v2478_v37, %v2517_v14  ;;  %v1436_v14 = vadd.s32 152, %v2494_v50 }
  0xcf   : > { %v903_v22 = vadd.f32 %v2481_v38, %v835_v20  ;;  %v2189_v20 = vunpack.c.l.bf16 %v2266_v6  ;;  %v2166_v60 = vunpack.c.h.bf16 %v2260_v16 }
  0xd0   : > { %v932_v34 = vadd.f32 %v2481_v38, %v864_v19 }
  0xd1   : > { %v1163_v24 = vsub.f32 %v903_v22, %v1099_v13  ;;  %vm1227_vm1 = vcmp.gt.f32.partialorder %v903_v22, %v1099_v13  ;;  %v851_v13 = vmul.f32 %v2478_v37, %v2523_v18  ;;  %v2137_v22 = vunpack.c.l.bf16 %v2582_v11 }
  0xd2   : > { %vm1355_vm2 = vmor %vm1227_vm1, %vm1291_vm15  ;;  %vm1500_vm1 = vcmp.lt.s32.totalorder %v1434_v1, %v2496_v51  ;;  %v1178_v18 = vsub.f32 %v918_v5, %v1114_v3  ;;  %v2752_v49 = vpop.f32.mrf.mxu3 }
  0xd3   : > { %vm1550_vm3 = vmand %vm1355_vm2, %vm1486_vm0  ;;  %v1614_v25 = vmul.f32 %v1163_v24, %v1163_v24  ;;  %v2564_v0 = vpop.f32.mrf.mxu2  ;;  %vm1242_vm2 = vcmp.gt.f32.partialorder %v918_v5, %v1114_v3  ;;  %v1115_v24 = vmax.f32 %v2162_v10, %v2484_v40  ;;  %v2138_v5 = vunpack.c.h.bf16 %v2582_v11 }
  0xd4   : > { %v678_v27 = vpop.f32.mrf.mxu0  ;;  %v2531_v29 = vpop.f32.mrf.mxu1  ;;  %vm2575_vm15 = vmand %vm1368_vm11, %vm1499_vm12  ;;  %v2634_v48 = vmul.f32 %v1178_v18, %v1178_v18  ;;  %v1450_v11 = vadd.s32 264, %v2494_v50  ;;  %v934_v10 = vadd.f32 %v2481_v38, %v866_v41  ;;  %v1451_v41 = vadd.s32 272, %v2494_v50 }
  0xd5   : > { %v1678_v30 = vsel %vm1550_vm3, %v1614_v25, 0.0  ;;  %v836_v31 = vmul.f32 %v2478_v37, %v678_v27  ;;  %vm1369_vm0 = vmor %vm1241_vm13, %vm1305_vm14  ;;  %vm1306_vm3 = vcmp.gt.f32.partialorder %v1114_v3, 0.0  ;;  %v919_v27 = vadd.f32 %v2481_v38, %v851_v13  ;;  %v2686_v13 = vld [vmem:[%s2474_s26 + $0x88] sm:$0xff]  }
  0xd6   : > { %v1741_v33 = vadd.f32 %v1740_v21, %v1678_v30  ;;  %v2592_v21 = vmul.f32 %v1177_v4, %v1177_v4  ;;  %v852_v28 = vmul.f32 %v2478_v37, %v2531_v29  ;;  %v2165_v30 = vunpack.c.l.bf16 %v2260_v16  ;;  %4406 = vst [vmem:[#allocation5_spill] sm:$0xff] %v2634_v48 }
  0xd7   : > { %v904_v35 = vadd.f32 %v2481_v38, %v836_v31  ;;  %vm1243_vm11 = vcmp.gt.f32.partialorder %v919_v27, %v1115_v24  ;;  %v1179_v59 = vsub.f32 %v919_v27, %v1115_v24  ;;  %v2669_v4 = vadd.s32 48, %v2494_v50 }
  0xd8   : > { %v920_v55 = vadd.f32 %v2481_v38, %v852_v28  ;;  %v1116_v58 = vmax.f32 %v2165_v30, %v2484_v40  ;;  %v4415_v16 = vmov 0  ;;  %v2716_v28 = vld [vmem:[%s2474_s26 + $0x20] sm:$0xff]   ;;  %v4421_v31 = vmov 0 }
  0xd9   : > { %v1164_v36 = vsub.f32 %v904_v35, %v1100_v26  ;;  %vm1228_vm6 = vcmp.gt.f32.partialorder %v904_v35, %v1100_v26  ;;  %v2607_v26 = vmax.f32 %v2134_v12, %v2484_v40  ;;  %v1128_v35 = vmax.f32 %v2189_v20, %v2484_v40 }
  0xda   : > { %vm1356_vm7 = vmor %vm1228_vm6, %vm1292_vm4  ;;  %vm1501_vm6 = vcmp.lt.s32.totalorder %v1435_v15, %v2496_v51  ;;  %v1117_v12 = vmax.f32 %v2166_v60, %v2484_v40  ;;  %v1180_v18 = vsub.f32 %v920_v55, %v1116_v58  ;;  %v4426_v60 = vmov 0 }
  0xdb   : > { %vm1551_vm8 = vmand %vm1356_vm7, %vm1487_vm5  ;;  %v1615_v39 = vmul.f32 %v1164_v36, %v1164_v36  ;;  %v2622_v36 = vpop.f32.mrf.mxu2  ;;  %vm1307_vm7 = vcmp.gt.f32.partialorder %v1115_v24, 0.0  ;;  %vm1293_vm10 = vcmp.gt.f32.partialorder %v2607_v26, 0.0  ;;  %vm1256_vm12 = vcmp.gt.f32.partialorder %v932_v34, %v1128_v35 }
  0xdc   : > { %v2540_v43 = vpop.f32.mrf.mxu0  ;;  %v2542_v45 = vpop.f32.mrf.mxu1  ;;  %vm2598_vm4 = vmand %vm1369_vm0, %vm1500_vm1  ;;  %vm1320_vm13 = vcmp.gt.f32.partialorder %v1128_v35, 0.0  ;;  %vm1244_vm1 = vcmp.gt.f32.partialorder %v920_v55, %v1116_v58  ;;  %v2878_v55 = vld [vmem:[%s2474_s26 + $0x28] sm:$0xff]  }
  0xdd   : > { %v1679_v44 = vsel %vm1551_vm8, %v1615_v39, 0.0  ;;  %v4403_v23 = vsel %vm2598_vm4, 4294967295, %v4402_v23  ;;  %vm2612_vm5 = vmor %vm1242_vm2, %vm1306_vm3  ;;  %v2628_v39 = vmax.f32 %v2137_v22, %v2484_v40  ;;  %vm1502_vm8 = vcmp.lt.s32.totalorder %v1436_v14, %v2496_v51 }
  0xde   : > { %v2544_v46 = vadd.f32 %v1741_v33, %v1679_v44  ;;  %v2618_v33 = vadd.s32 40, %v2494_v50  ;;  %v2190_v44 = vunpack.c.h.bf16 %v2266_v6  ;;  %vm2644_vm9 = vmand %vm2612_vm5, %vm1501_vm6  ;;  %v837_v32 = vmul.f32 %v2478_v37, %v2540_v43 }
  0xdf   : > { %v4408_v54 = vsel %vm2644_vm9, 4294967295, %v4407_v54  ;;  %v853_v62 = vmul.f32 %v2478_v37, %v2542_v45  ;;  %vm2664_vm0 = vmor %vm1243_vm11, %vm1307_vm7  ;;  %v1192_v45 = vsub.f32 %v932_v34, %v1128_v35  ;;  %vm1308_vm2 = vcmp.gt.f32.partialorder %v1116_v58, 0.0  ;;  %v2733_v35 = vld [vmem:[%s2474_s26 + $0x58] sm:$0xff]  }
  0xe0   : > { %4409 = vst [vmem:[#allocation6_spill] sm:$0xff] %v4408_v54  ;;  %v1129_v43 = vmax.f32 %v2190_v44, %v2484_v40  ;;  %v905_v3 = vadd.f32 %v2481_v38, %v837_v32  ;;  %vm1503_vm3 = vcmp.lt.s32.totalorder %v1437_v52, %v2496_v51  ;;  %v2674_v6 = vmul.f32 %v1179_v59, %v1179_v59  ;;  %vm2678_vm5 = vmor %vm1256_vm12, %vm1320_vm13 }
  0xe1   : > { %vm1515_vm6 = vcmp.lt.s32.totalorder %v1449_v42, %v2496_v51  ;;  %vm2694_vm7 = vmand %vm2664_vm0, %vm1502_vm8  ;;  %v921_v20 = vadd.f32 %v2481_v38, %v853_v62  ;;  %v2710_v14 = vmul.f32 %v1192_v45, %v1192_v45  ;;  %v2730_v34 = vadd.s32 56, %v2494_v50 }
  0xe2   : > { %4412 = vst [vmem:[#allocation7_spill] sm:$0xff] %v2674_v6  ;;  %v4416_v16 = vsel %vm2694_vm7, 4294967295, %v4415_v16  ;;  %vm1257_vm12 = vcmp.gt.f32.partialorder %v933_v63, %v1129_v43  ;;  %vm1321_vm13 = vcmp.gt.f32.partialorder %v1129_v43, 0.0  ;;  %vm2706_vm14 = vmor %vm1244_vm1, %vm1308_vm2  ;;  %v1193_v27 = vsub.f32 %v933_v63, %v1129_v43 }
  0xe3   : > { %4417 = vst [vmem:[#allocation8_spill] sm:$0xff] %v4416_v16  ;;  %v2718_v30 = vpop.f32.mrf.mxu2  ;;  %vm1229_vm8 = vcmp.gt.f32.partialorder %v905_v3, %v2607_v26  ;;  %vm2725_vm0 = vmand %vm2678_vm5, %vm1515_vm6  ;;  %v2193_v44 = vunpack.c.l.bf16 %v2686_v13  ;;  %v1165_v32 = vsub.f32 %v905_v3, %v2607_v26  ;;  %v1438_v58 = vadd.s32 168, %v2494_v50 }
  0xe4   : > { %v2554_v57 = vpop.f32.mrf.mxu0  ;;  %v2560_v61 = vpop.f32.mrf.mxu1  ;;  %4420 = vst [vmem:[#allocation9_spill] sm:$0xff] %v2710_v14  ;;  %v4422_v31 = vsel %vm2725_vm0, 4294967295, %v4421_v31  ;;  %vm2747_vm2 = vmor %vm1257_vm12, %vm1321_vm13  ;;  %vm1516_vm5 = vcmp.lt.s32.totalorder %v1450_v11, %v2496_v51  ;;  %vm1245_vm1 = vcmp.gt.f32.partialorder %v921_v20, %v1117_v12  ;;  %vm1309_vm11 = vcmp.gt.f32.partialorder %v1117_v12, 0.0 }
  0xe5   : > { %v838_v19 = vmul.f32 %v2478_v37, %v2554_v57  ;;  %v2713_v57 = vmax.f32 %v2138_v5, %v2484_v40  ;;  %4423 = vst [vmem:[#allocation10_spill] sm:$0xff] %v4422_v31  ;;  %vm2759_vm6 = vmand %vm2706_vm14, %vm1503_vm3  ;;  %v2141_v62 = vunpack.c.l.bf16 %v2716_v28  ;;  %v2772_v43 = vmul.f32 %v1180_v18, %v1180_v18 }
  0xe6   : > { %v4427_v60 = vsel %vm2759_vm6, 4294967295, %v4426_v60  ;;  %vm2768_vm12 = vmor %vm1229_vm8, %vm1293_vm10  ;;  %v2777_v1 = vmul.f32 %v1193_v27, %v1193_v27  ;;  %v2169_v45 = vunpack.c.l.bf16 %v2733_v35  ;;  %v1181_v26 = vsub.f32 %v921_v20, %v1117_v12 }
  0xe7   : > { %v906_v42 = vadd.f32 %v2481_v38, %v838_v19  ;;  %4428 = vst [vmem:[#allocation11_spill] sm:$0xff] %v4427_v60  ;;  %vm2787_vm10 = vmand %vm2747_vm2, %vm1516_vm5  ;;  %v4433_v3 = vmov 0  ;;  %v1130_v19 = vmax.f32 %v2193_v44, %v2484_v40  ;;  %v1616_v18 = vmul.f32 %v1165_v32, %v1165_v32 }
  0xe8   : > { %4431 = vst [vmem:[#allocation12_spill] sm:$0xff] %v2772_v43  ;;  %v4434_v3 = vsel %vm2787_vm10, 4294967295, %v4433_v3  ;;  %vm2794_vm3 = vmor %vm1245_vm1, %vm1309_vm11  ;;  %vm1504_vm13 = vcmp.lt.s32.totalorder %v1438_v58, %v2496_v51  ;;  %v854_v11 = vmul.f32 %v2478_v37, %v2560_v61  ;;  %vm4438_vm8 = vcmp.lt.s32.totalorder %v2618_v33, %v2496_v51 }
  0xe9   : > { %4432 = vst [vmem:[#allocation13_spill] sm:$0xff] %v2777_v1  ;;  %vm2809_vm2 = vmand %vm2768_vm12, %vm4438_vm8  ;;  %vm1230_vm11 = vcmp.gt.f32.partialorder %v906_v42, %v2628_v39  ;;  %v2815_v12 = vmax.f32 %v2141_v62, %v2484_v40  ;;  %v2818_v20 = vadd.s32 176, %v2494_v50  ;;  %v1166_v33 = vsub.f32 %v906_v42, %v2628_v39 }
  0xea   : > { %4435 = vst [vmem:[#allocation14_spill] sm:$0xff] %v4434_v3  ;;  %v1118_v59 = vmax.f32 %v2169_v45, %v2484_v40  ;;  %vm2840_vm5 = vmand %vm2794_vm3, %vm1504_vm13  ;;  %v4441_v52 = vmov 0  ;;  %v2844_v44 = vmul.f32 %v1181_v26, %v1181_v26  ;;  %vm1258_vm12 = vcmp.gt.f32.partialorder %v934_v10, %v1130_v19 }
  0xeb   : > { %v4442_v52 = vsel %vm2840_vm5, 4294967295, %v4441_v52  ;;  %vm1322_vm8 = vcmp.gt.f32.partialorder %v1130_v19, 0.0  ;;  %v1680_v32 = vsel %vm2809_vm2, %v1616_v18, 0.0  ;;  %vm4445_vm1 = vcmp.gt.f32.partialorder %v2628_v39, 0.0  ;;  %v2858_v24 = vpop.f32.mrf.mxu2 }
  0xec   : > { %v2573_v7 = vpop.f32.mrf.mxu0  ;;  %v2604_v25 = vpop.f32.mrf.mxu1  ;;  %4443 = vst [vmem:[#allocation15_spill] sm:$0xff] %v4442_v52  ;;  %vm2852_vm14 = vmor %vm1230_vm11, %vm4445_vm1  ;;  %v922_v45 = vadd.f32 %v2481_v38, %v854_v11  ;;  %v2142_v26 = vunpack.c.h.bf16 %v2716_v28  ;;  %vm1517_vm13 = vcmp.lt.s32.totalorder %v1451_v41, %v2496_v51  ;;  %v2170_v18 = vunpack.c.h.bf16 %v2733_v35 }
  0xed   : > { %v839_v5 = vmul.f32 %v2478_v37, %v2573_v7  ;;  %v2800_v7 = vadd.s32 64, %v2494_v50  ;;  %4444 = vst [vmem:[#allocation16_spill] sm:$0xff] %v2844_v44  ;;  %v867_v39 = vmul.f32 %v2478_v37, %v2564_v0  ;;  %v1617_v42 = vmul.f32 %v1166_v33, %v1166_v33  ;;  %vm2870_vm11 = vmor %vm1258_vm12, %vm1322_vm8  ;;  %v2880_v0 = vpop.f32.mrf.mxu3  ;;  %v2906_v33 = vld [vmem:[%s2474_s26 + $0x90] sm:$0xff]  }
  0xee   : > { %v855_v11 = vmul.f32 %v2478_v37, %v2604_v25  ;;  %v2194_v35 = vunpack.c.h.bf16 %v2686_v13  ;;  %4450 = vst [vmem:[#allocation17_spill] sm:$0xff] %v2880_v0  ;;  %vm4451_vm1 = vcmp.lt.s32.totalorder %v2669_v4, %v2496_v51  ;;  %vm1310_vm2 = vcmp.gt.f32.partialorder %v1118_v59, 0.0 }
  0xef   : > { %v907_v63 = vadd.f32 %v2481_v38, %v839_v5  ;;  %v1194_v5 = vsub.f32 %v934_v10, %v1130_v19  ;;  %vm2888_vm12 = vmand %vm2852_vm14, %vm4451_vm1  ;;  %vm1246_vm3 = vcmp.gt.f32.partialorder %v922_v45, %v1118_v59  ;;  %v2900_v4 = vmax.f32 %v2142_v26, %v2484_v40  ;;  %v2903_v19 = vld [vmem:[%s2474_s26 + $0x60] sm:$0xff]  }
  0xf0   : > { %vm2914_vm1 = vmand %vm2870_vm11, %vm1517_vm13  ;;  %v4455_v58 = vmov 0  ;;  %v2922_v26 = vadd.f32 %v2481_v38, %v867_v39  ;;  %v2145_v25 = vunpack.c.l.bf16 %v2878_v55  ;;  %v1681_v29 = vsel %vm2888_vm12, %v1617_v42, 0.0 }
  0xf1   : > { %vm1231_vm8 = vcmp.gt.f32.partialorder %v907_v63, %v2713_v57  ;;  %v1167_v13 = vsub.f32 %v907_v63, %v2713_v57  ;;  %v4456_v58 = vsel %vm2914_vm1, 4294967295, %v4455_v58  ;;  %vm4458_vm14 = vcmp.gt.f32.partialorder %v2713_v57, 0.0  ;;  %vm2946_vm11 = vmor %vm1246_vm3, %vm1310_vm2 }
  0xf2   : > { %4457 = vst [vmem:[#allocation19_spill] sm:$0xff] %v4456_v58  ;;  %vm2933_vm13 = vmor %vm1231_vm8, %vm4458_vm14  ;;  %v2939_v39 = vadd.f32 %v2481_v38, %v855_v11  ;;  %v2942_v28 = vmax.f32 %v2194_v35, %v2484_v40  ;;  %v2951_v57 = vadd.s32 72, %v2494_v50  ;;  %v2173_v63 = vunpack.c.l.bf16 %v2903_v19 }
  0xf3   : > { %v2197_v11 = vunpack.c.l.bf16 %v2906_v33  ;;  %v1618_v10 = vmul.f32 %v1167_v13, %v1167_v13  ;;  %vm4463_vm3 = vcmp.lt.s32.totalorder %v2730_v34, %v2496_v51  ;;  %vm4467_vm8 = vcmp.lt.s32.totalorder %v2818_v20, %v2496_v51  ;;  %v3004_v41 = vpop.f32.mrf.mxu2 }
  0xf4   : > { %v2632_v47 = vpop.f32.mrf.mxu0  ;;  %v2688_v15 = vpop.f32.mrf.mxu1  ;;  %vm2972_vm2 = vmand %vm2933_vm13, %vm4463_vm3  ;;  %v3008_v20 = vmax.f32 %v2173_v63, %v2484_v40  ;;  %vm4472_vm13 = vcmp.gt.f32.partialorder %v2815_v12, 0.0  ;;  %v2256_v63 = vld [vmem:[%s2474_s26 + $0x30] sm:$0xff]  }
  0xf5   : > { %v840_v27 = vmul.f32 %v2478_v37, %v2632_v47  ;;  %v1743_v47 = vadd.f32 %v2544_v46, %v1680_v32  ;;  %v2897_v46 = vmul.f32 %v1194_v5, %v1194_v5  ;;  %v1182_v32 = vsub.f32 %v922_v45, %v1118_v59  ;;  %vm2993_vm14 = vmand %vm2946_vm11, %vm4467_vm8  ;;  %v3024_v52 = vpop.f32.mrf.mxu3 }
  0xf6   : > { %v2919_v5 = vmax.f32 %v2170_v18, %v2484_v40  ;;  %v2961_v45 = vadd.s32 184, %v2494_v50  ;;  %v856_v35 = vmul.f32 %v2478_v37, %v2688_v15  ;;  %v2979_v59 = vadd.s32 280, %v2494_v50  ;;  %v2985_v15 = vld [vmem:[%s2474_s26 + $0xc0] sm:$0xff]   ;;  %4471 = vst [vmem:[#allocation22_spill] sm:$0xff] %v3024_v52 }
  0xf7   : > { %4454 = vst [vmem:[#allocation18_spill] sm:$0xff] %v2897_v46  ;;  %v908_v18 = vadd.f32 %v2481_v38, %v840_v27  ;;  %v868_v27 = vmul.f32 %v2478_v37, %v2622_v36  ;;  %v1744_v1 = vadd.f32 %v1743_v47, %v1681_v29  ;;  %v2976_v13 = vmul.f32 %v1182_v32, %v1182_v32 }
  0xf8   : > { %v2982_v46 = vadd.s32 80, %v2494_v50  ;;  %v4468_v29 = vmov 0  ;;  %v1183_v34 = vsub.f32 %v2939_v39, %v2919_v5  ;;  %v1195_v47 = vsub.f32 %v2922_v26, %v2942_v28 }
  0xf9   : > { %4466 = vst [vmem:[#allocation20_spill] sm:$0xff] %v2976_v13  ;;  %vm1232_vm12 = vcmp.gt.f32.partialorder %v908_v18, %v2815_v12  ;;  %v4469_v29 = vsel %vm2993_vm14, 4294967295, %v4468_v29  ;;  %v3002_v32 = vmax.f32 %v2145_v25, %v2484_v40  ;;  %v1168_v58 = vsub.f32 %v908_v18, %v2815_v12 }
  0xfa   : > { %4470 = vst [vmem:[#allocation21_spill] sm:$0xff] %v4469_v29  ;;  %v3011_v42 = vadd.f32 %v2481_v38, %v868_v27  ;;  %v3014_v3 = vmax.f32 %v2197_v11, %v2484_v40  ;;  %v1682_v14 = vsel %vm2972_vm2, %v1618_v10, 0.0  ;;  %v3019_v31 = vadd.f32 %v2481_v38, %v856_v35  ;;  %vm3030_vm11 = vmor %vm1232_vm12, %vm4472_vm13 }
  0xfb   : > { %v880_v25 = vmul.f32 %v2478_v37, %v2568_v2  ;;  %v2221_v44 = vunpack.c.l.bf16 %v2985_v15  ;;  %v3046_v12 = vmul.f32 %v1183_v34, %v1183_v34  ;;  %v3048_v18 = vmul.f32 %v1195_v47, %v1195_v47  ;;  %v3116_v34 = vpop.f32.mrf.mxu2 }
  0xfc   : > { %v2702_v22 = vpop.f32.mrf.mxu0  ;;  %v2833_v62 = vpop.f32.mrf.mxu1  ;;  %v3051_v10 = vadd.s32 192, %v2494_v50  ;;  %v1745_v35 = vadd.f32 %v1744_v1, %v1682_v14  ;;  %v1619_v36 = vmul.f32 %v1168_v58, %v1168_v58  ;;  %v1196_v52 = vsub.f32 %v3011_v42, %v3014_v3  ;;  %4478 = vst [vmem:[#allocation23_spill] sm:$0xff] %v3116_v34  ;;  %v3133_v34 = vld [vmem:[%s2474_s26 + $0x38] sm:$0xff]  }
  0xfd   : > { %v841_v11 = vmul.f32 %v2478_v37, %v2702_v22  ;;  %v3054_v22 = vadd.s32 288, %v2494_v50  ;;  %vm4475_vm12 = vcmp.lt.s32.totalorder %v2800_v7, %v2496_v51  ;;  %v1184_v14 = vsub.f32 %v3019_v31, %v3008_v20  ;;  %v3135_v16 = vpop.f32.mrf.mxu3 }
  0xfe   : > { %vm3066_vm13 = vmand %vm3030_vm11, %vm4475_vm12  ;;  %v3075_v1 = vadd.f32 %v2481_v38, %v880_v25  ;;  %v2146_v7 = vunpack.c.h.bf16 %v2878_v55  ;;  %v3087_v47 = vadd.s32 384, %v2494_v50  ;;  %v3094_v55 = vadd.s32 88, %v2494_v50  ;;  %4479 = vst [vmem:[#allocation24_spill] sm:$0xff] %v3135_v16 }
  0xff   : > { %v909_v58 = vadd.f32 %v2481_v38, %v841_v11  ;;  %v2174_v25 = vunpack.c.h.bf16 %v2903_v19  ;;  %v1683_v13 = vsel %vm3066_vm13, %v1619_v36, 0.0  ;;  %v3105_v0 = vmul.f32 %v1196_v52, %v1196_v52 }
 0x100   : > { %v3109_v60 = vmul.f32 %v1184_v14, %v1184_v14  ;;  %v1107_v19 = vmax.f32 %v2146_v7, %v2484_v40  ;;  %v3121_v36 = vadd.f32 %v1745_v35, %v1683_v13  ;;  %v2150_v35 = vunpack.c.h.bf16 %v2256_v63 }
 0x101   : > { %vm1233_vm13 = vcmp.gt.f32.partialorder %v909_v58, %v2900_v4  ;;  %v1169_v14 = vsub.f32 %v909_v58, %v2900_v4  ;;  %v3130_v7 = vmax.f32 %v2174_v25, %v2484_v40  ;;  %vm4480_vm11 = vcmp.gt.f32.partialorder %v2900_v4, 0.0 }
 0x102   : > { %vm3146_vm12 = vmor %vm1233_vm13, %vm4480_vm11  ;;  %vm4483_vm8 = vcmp.gt.f32.partialorder %v2942_v28, 0.0  ;;  %vm4484_vm2 = vcmp.gt.f32.partialorder %v2922_v26, %v2942_v28  ;;  %v869_v4 = vmul.f32 %v2478_v37, %v2718_v30  ;;  %v2198_v58 = vunpack.c.h.bf16 %v2906_v33 }
 0x103   : > { %vm3155_vm1 = vmor %vm4484_vm2, %vm4483_vm8  ;;  %vm4487_vm11 = vcmp.gt.f32.partialorder %v2919_v5, 0.0  ;;  %vm4488_vm13 = vcmp.gt.f32.partialorder %v2939_v39, %v2919_v5  ;;  %v2153_v33 = vunpack.c.l.bf16 %v3133_v34  ;;  %vm4491_vm3 = vcmp.gt.f32.partialorder %v3002_v32, 0.0  ;;  %v3268_v54 = vpop.f32.mrf.mxu2 }
 0x104   : > { %v2821_v61 = vpop.f32.mrf.mxu0  ;;  %v2965_v17 = vpop.f32.mrf.mxu1  ;;  %vm3171_vm2 = vmor %vm4488_vm13, %vm4487_vm11  ;;  %vm4495_vm13 = vcmp.gt.f32.partialorder %v3014_v3, 0.0  ;;  %vm4496_vm8 = vcmp.gt.f32.partialorder %v3011_v42, %v3014_v3  ;;  %v1429_v42 = vadd.s32 96, %v2494_v50  ;;  %vm4502_vm5 = vcmp.gt.f32.partialorder %v3008_v20, 0.0  ;;  %4513 = vst [vmem:[#allocation25_spill] sm:$0xff] %v3268_v54  ;;  %v3288_v3 = vld [vmem:[%s2474_s26 + $0x68] sm:$0xff]  }
 0x105   : > { %v842_v27 = vmul.f32 %v2478_v37, %v2821_v61  ;;  %v3078_v61 = vmax.f32 %v2221_v44, %v2484_v40  ;;  %v857_v44 = vmul.f32 %v2478_v37, %v2833_v62  ;;  %vm3194_vm0 = vmor %vm4496_vm8, %vm4495_vm13  ;;  %v3238_v16 = vmax.f32 %v2198_v58, %v2484_v40  ;;  %v3292_v54 = vpop.f32.mrf.mxu3 }
 0x106   : > { %vm4506_vm13 = vcmp.lt.s32.totalorder %v2982_v46, %v2496_v51  ;;  %vm4509_vm6 = vcmp.gt.f32.partialorder %v1107_v19, 0.0  ;;  %v1430_v5 = vadd.s32 104, %v2494_v50  ;;  %v2154_v25 = vunpack.c.h.bf16 %v3133_v34 }
 0x107   : > { %v910_v29 = vadd.f32 %v2481_v38, %v842_v27  ;;  %v1208_v62 = vsub.f32 %v3075_v1, %v3078_v61  ;;  %v3127_v6 = vadd.f32 %v2481_v38, %v857_v44  ;;  %v3235_v44 = vadd.f32 %v2481_v38, %v869_v4 }
 0x108   : > { %v1432_v39 = vadd.s32 120, %v2494_v50 }
 0x109   : > { %v1170_v28 = vsub.f32 %v910_v29, %v3002_v32  ;;  %vm4492_vm10 = vcmp.gt.f32.partialorder %v910_v29, %v3002_v32  ;;  %v3205_v29 = vadd.s32 200, %v2494_v50  ;;  %v3208_v32 = vadd.s32 296, %v2494_v50 }
 0x10a   : > { %vm3185_vm11 = vmor %vm4492_vm10, %vm4491_vm3  ;;  %vm4499_vm10 = vcmp.lt.s32.totalorder %v2951_v57, %v2496_v51  ;;  %v1197_v57 = vsub.f32 %v3235_v44, %v3238_v16 }
 0x10b   : > { %vm3215_vm3 = vmand %vm3146_vm12, %vm4499_vm10  ;;  %vm4503_vm12 = vcmp.gt.f32.partialorder %v3019_v31, %v3008_v20  ;;  %v1621_v20 = vmul.f32 %v1170_v28, %v1170_v28 }
 0x10c   : > { %v2925_v56 = vpop.f32.mrf.mxu0  ;;  %v3100_v11 = vpop.f32.mrf.mxu1  ;;  %vm3230_vm10 = vmor %vm4503_vm12, %vm4502_vm5 }
 0x10d   : > { %v843_v43 = vmul.f32 %v2478_v37, %v2925_v56  ;;  %v2149_v56 = vunpack.c.l.bf16 %v2256_v63  ;;  %vm3249_vm5 = vmand %vm3185_vm11, %vm4506_vm13  ;;  %vm4514_vm13 = vcmp.gt.f32.partialorder %v3078_v61, 0.0 }
 0x10f   : > { %v911_v13 = vadd.f32 %v2481_v38, %v843_v43  ;;  %v3161_v43 = vmul.f32 %v1208_v62, %v1208_v62  ;;  %v1108_v30 = vmax.f32 %v2149_v56, %v2484_v40  ;;  %v1620_v62 = vmul.f32 %v1169_v14, %v1169_v14 }
 0x111   : > { %v1171_v14 = vsub.f32 %v911_v13, %v1107_v19  ;;  %vm1300_vm8 = vcmp.gt.f32.partialorder %v1108_v30, 0.0  ;;  %v1684_v58 = vsel %vm3215_vm3, %v1620_v62, 0.0  ;;  %vm4510_vm7 = vcmp.gt.f32.partialorder %v911_v13, %v1107_v19 }
 0x112   : > { %vm3260_vm9 = vmor %vm4510_vm7, %vm4509_vm6  ;;  %vm4515_vm3 = vcmp.gt.f32.partialorder %v3075_v1, %v3078_v61  ;;  %v2222_v13 = vunpack.c.h.bf16 %v2985_v15  ;;  %v1747_v15 = vadd.f32 %v3121_v36, %v1684_v58  ;;  %v1446_v36 = vadd.s32 232, %v2494_v50 }
 0x113   : > { %vm3275_vm12 = vmor %vm4515_vm3, %vm4514_vm13  ;;  %vm4523_vm3 = vcmp.lt.s32.totalorder %v2961_v45, %v2496_v51  ;;  %vm4528_vm13 = vcmp.lt.s32.totalorder %v2979_v59, %v2496_v51  ;;  %v2177_v59 = vunpack.c.l.bf16 %v3288_v3 }
 0x114   : > { %v698_v2 = vpop.f32.mrf.mxu0  ;;  %vm3314_vm7 = vmand %vm3171_vm2, %vm4523_vm3 }
 0x115   : > { %v844_v52 = vmul.f32 %v2478_v37, %v698_v2  ;;  %vm3330_vm2 = vmand %vm3155_vm1, %vm4528_vm13  ;;  %vm4534_vm1 = vcmp.lt.s32.totalorder %v3051_v10, %v2496_v51 }
 0x116   : > { %vm3352_vm13 = vmand %vm3230_vm10, %vm4534_vm1  ;;  %vm4540_vm10 = vcmp.lt.s32.totalorder %v3054_v22, %v2496_v51  ;;  %v1111_v22 = vmax.f32 %v2154_v25, %v2484_v40 }
 0x117   : > { %v912_v63 = vadd.f32 %v2481_v38, %v844_v52  ;;  %v3202_v52 = vsub.f32 %v3127_v6, %v3130_v7  ;;  %vm3370_vm1 = vmand %vm3194_vm0, %vm4540_vm10  ;;  %vm4545_vm0 = vcmp.gt.f32.partialorder %v3130_v7, 0.0 }
 0x119   : > { %vm1236_vm14 = vcmp.gt.f32.partialorder %v912_v63, %v1108_v30  ;;  %v1172_v28 = vsub.f32 %v912_v63, %v1108_v30  ;;  %v1443_v63 = vadd.s32 208, %v2494_v50 }
 0x11a   : > { %vm3283_vm4 = vmor %vm1236_vm14, %vm1300_vm8  ;;  %vm4520_vm14 = vcmp.lt.s32.totalorder %v3094_v55, %v2496_v51 }
 0x11b   : > { %vm3302_vm8 = vmand %vm3260_vm9, %vm4520_vm14  ;;  %v1623_v55 = vmul.f32 %v1172_v28, %v1172_v28 }
 0x11c   : > { %v700_v27 = vpop.f32.mrf.mxu0 }
 0x11d   : > { %v845_v2 = vmul.f32 %v2478_v37, %v700_v27  ;;  %v1109_v27 = vmax.f32 %v2150_v35, %v2484_v40  ;;  %v3242_v35 = vpop.f32.mrf.mxu1 }
 0x11f   : > { %v913_v56 = vadd.f32 %v2481_v38, %v845_v2  ;;  %v881_v2 = vmul.f32 %v2478_v37, %v2638_v53  ;;  %v1110_v53 = vmax.f32 %v2153_v33, %v2484_v40  ;;  %vm1301_vm11 = vcmp.gt.f32.partialorder %v1109_v27, 0.0 }
 0x120   : > { %v1622_v33 = vmul.f32 %v1171_v14, %v1171_v14  ;;  %v1685_v14 = vsel %vm3249_vm5, %v1621_v20, 0.0  ;;  %vm1496_vm5 = vcmp.lt.s32.totalorder %v1430_v5, %v2496_v51  ;;  %v1145_v20 = vmax.f32 %v2222_v13, %v2484_v40 }
 0x121   : > { %vm1237_vm6 = vcmp.gt.f32.partialorder %v913_v56, %v1109_v27  ;;  %v1173_v1 = vsub.f32 %v913_v56, %v1109_v27  ;;  %v949_v26 = vadd.f32 %v2481_v38, %v881_v2  ;;  %v858_v27 = vmul.f32 %v2478_v37, %v2965_v17  ;;  %v3457_v56 = vpop.f32.mrf.mxu3 }
 0x122   : > { %vm3320_vm9 = vmor %vm1237_vm6, %vm1301_vm11  ;;  %vm4531_vm11 = vcmp.lt.s32.totalorder %v1429_v42, %v2496_v51  ;;  %v1686_v2 = vsel %vm3302_vm8, %v1622_v33, 0.0  ;;  %v1748_v10 = vadd.f32 %v1747_v15, %v1685_v14  ;;  %v3423_v15 = vld [vmem:[%s2474_s26 + $0x98] sm:$0xff]   ;;  %v3428_v14 = vpop.f32.mrf.mxu2 }
 0x123   : > { %vm3339_vm6 = vmand %vm3283_vm4, %vm4531_vm11  ;;  %v1624_v58 = vmul.f32 %v1173_v1, %v1173_v1  ;;  %vm4537_vm4 = vcmp.gt.f32.partialorder %v1110_v53, 0.0 }
 0x124   : > { %v703_v4 = vpop.f32.mrf.mxu0  ;;  %vm3380_vm8 = vmand %vm3320_vm9, %vm1496_vm5  ;;  %vm1261_vm9 = vcmp.gt.f32.partialorder %v3235_v44, %v3238_v16  ;;  %v1687_v5 = vsel %vm3339_vm6, %v1623_v55, 0.0  ;;  %v1749_v1 = vadd.f32 %v1748_v10, %v1686_v2  ;;  %vm1325_vm5 = vcmp.gt.f32.partialorder %v3238_v16, 0.0  ;;  %v3655_v2 = vld [vmem:[%s2474_s26 + $0xa0] sm:$0xff]  }
 0x125   : > { %v846_v48 = vmul.f32 %v2478_v37, %v703_v4  ;;  %v1431_v4 = vadd.s32 112, %v2494_v50  ;;  %v3400_v62 = vpop.f32.mrf.mxu1  ;;  %vm4551_vm6 = vcmp.lt.s32.totalorder %v3087_v47, %v2496_v51  ;;  %v2201_v16 = vunpack.c.l.bf16 %v3423_v15 }
 0x126   : > { %v1750_v19 = vadd.f32 %v1749_v1, %v1687_v5  ;;  %v3520_v5 = vld [vmem:[%s2429_s19] ss:$0 sm:$0xff] }
 0x127   : > { %v914_v61 = vadd.f32 %v2481_v38, %v846_v48  ;;  %v3307_v48 = vadd.s32 392, %v2494_v50  ;;  %vm1497_vm11 = vcmp.lt.s32.totalorder %v1431_v4, %v2496_v51 }
 0x129   : > { %v1174_v31 = vsub.f32 %v914_v61, %v1110_v53  ;;  %vm1238_vm14 = vcmp.gt.f32.partialorder %v914_v61, %v1110_v53  ;;  %v4593_v53 = vld [vmem:[#allocation16_spill] sm:$0xff] }
 0x12a   : > { %vm3360_vm3 = vmor %vm1238_vm14, %vm4537_vm4  ;;  %vm4546_vm14 = vcmp.gt.f32.partialorder %v3127_v6, %v3130_v7  ;;  %v926_v6 = vadd.f32 %v2481_v38, %v858_v27  ;;  %v1122_v7 = vmax.f32 %v2177_v59, %v2484_v40  ;;  %v1688_v40 = vsel %vm3380_vm8, %v1624_v58, 0.0 }
 0x12b   : > { %vm3391_vm4 = vmor %vm4546_vm14, %vm4545_vm0  ;;  %v1625_v13 = vmul.f32 %v1174_v31, %v1174_v31  ;;  %vm1498_vm8 = vcmp.lt.s32.totalorder %v1432_v39, %v2496_v51  ;;  %v1751_v44 = vadd.f32 %v1750_v19, %v1688_v40  ;;  %v1209_v27 = vsub.f32 %v949_v26, %v1145_v20  ;;  %v3514_v39 = vld [vmem:[%s2423_s16] ss:$0 sm:$0xff] }
 0x12c   : > { %v705_v46 = vpop.f32.mrf.mxu0  ;;  %vm3409_vm10 = vmand %vm3360_vm3, %vm1497_vm11  ;;  %vm1303_vm3 = vcmp.gt.f32.partialorder %v1111_v22, 0.0  ;;  %vm4554_vm11 = vcmp.lt.s32.totalorder %v3205_v29, %v2496_v51  ;;  %v3451_v29 = vld [vmem:[%s2416_s13] ss:$0 sm:$0xff]  ;;  %v3474_v58 = vmul.f32 %v3202_v52, %v3202_v52  ;;  %v4578_v52 = vld [vmem:[#allocation6_spill] sm:$0xff] }
 0x12d   : > { %v847_v33 = vmul.f32 %v2478_v37, %v705_v46  ;;  %vm3418_vm0 = vmand %vm3275_vm12, %vm4551_vm6  ;;  %v4552_v37 = vmov 0  ;;  %v870_v55 = vmul.f32 %v3451_v29, %v2858_v24  ;;  %v1689_v30 = vsel %vm3409_vm10, %v1625_v13, 0.0  ;;  %v743_v40 = vpop.f32.mrf.mxu1 }
 0x12e   : > { %v4553_v37 = vsel %vm3418_vm0, 4294967295, %v4552_v37  ;;  %vm3435_vm12 = vmand %vm3391_vm4, %vm4554_vm11  ;;  %vm1250_vm11 = vcmp.gt.f32.partialorder %v926_v6, %v1122_v7  ;;  %vm1314_vm6 = vcmp.gt.f32.partialorder %v1122_v7, 0.0  ;;  %v1186_v24 = vsub.f32 %v926_v6, %v1122_v7 }
 0x12f   : > { %v915_v4 = vadd.f32 %v2481_v38, %v847_v33  ;;  %vm3446_vm14 = vmor %vm1261_vm9, %vm1325_vm5  ;;  %v1752_v10 = vadd.f32 %v1751_v44, %v1689_v30  ;;  %v3487_v46 = vmul.f32 %v1197_v57, %v1197_v57  ;;  %v3517_v28 = vadd.f32 %v3514_v39, %v870_v55  ;;  %v2264_v55 = vld [vmem:[%s2474_s26 + $0x70] sm:$0xff]  }
 0x130   : > { %v3523_v13 = vmax.f32 %v2201_v16, %v3520_v5  ;;  %v4570_v6 = vmov 0  ;;  %v3540_v7 = vmul.f32 %v1209_v27, %v1209_v27  ;;  %v3542_v61 = vmul.f32 %v1186_v24, %v1186_v24  ;;  %v3572_v27 = vpop.f32.mrf.mxu2 }
 0x131   : > { %v1175_v31 = vsub.f32 %v915_v4, %v1111_v22  ;;  %vm1239_vm4 = vcmp.gt.f32.partialorder %v915_v4, %v1111_v22  ;;  %v882_v19 = vmul.f32 %v3451_v29, %v2752_v49  ;;  %v4575_v30 = vsel %vm2575_vm15, %v2579_v9, 0.0 }
 0x132   : > { %vm1367_vm9 = vmor %vm1239_vm4, %vm1303_vm3  ;;  %vm4561_vm3 = vcmp.gt.f32.partialorder %v1145_v20, 0.0  ;;  %vm4562_vm4 = vcmp.gt.f32.partialorder %v949_v26, %v1145_v20  ;;  %v3497_v26 = vld [vmem:[%s2474_s26 + $0xc8] sm:$0xff]   ;;  %4572 = vst [vmem:[#allocation26_spill] sm:$0xff] %v3540_v7  ;;  %v3567_v16 = vadd.s32 304, %v2494_v50  ;;  %v859_v44 = vmul.f32 %v3451_v29, %v3100_v11  ;;  %v4595_v7 = vld [vmem:[#allocation21_spill] sm:$0xff] }
 0x133   : > { %vm3465_vm10 = vmand %vm1367_vm9, %vm1498_vm8  ;;  %v1626_v25 = vmul.f32 %v1175_v31, %v1175_v31  ;;  %vm1532_vm8 = vcmp.lt.s32.totalorder %v3307_v48, %v2496_v51  ;;  %v2225_v38 = vunpack.c.l.bf16 %v3497_v26  ;;  %v2178_v49 = vunpack.c.h.bf16 %v3288_v3 }
 0x134   : > { %vm3478_vm5 = vmor %vm4562_vm4, %vm4561_vm3  ;;  %vm1509_vm3 = vcmp.lt.s32.totalorder %v1443_v63, %v2496_v51  ;;  %vm4567_vm4 = vcmp.lt.s32.totalorder %v3208_v32, %v2496_v51  ;;  %v1198_v8 = vsub.f32 %v3517_v28, %v3523_v13  ;;  %v871_v9 = vmul.f32 %v3451_v29, %v3004_v41  ;;  %v3591_v41 = vpop.f32.mrf.mxu3  ;;  %v4591_v32 = vld [vmem:[#allocation15_spill] sm:$0xff] }
 0x135   : > { %vm3491_vm9 = vmor %vm1250_vm11, %vm1314_vm6  ;;  %v1690_v20 = vsel %vm3465_vm10, %v1626_v25, 0.0  ;;  %v2202_v24 = vunpack.c.h.bf16 %v3423_v15  ;;  %vm4576_vm15 = vnez %v4403_v23  ;;  %v860_v17 = vmul.f32 %v3451_v29, %v3242_v35 }
 0x136   : > { %vm3509_vm6 = vmand %vm3446_vm14, %vm4567_vm4  ;;  %v1753_v33 = vadd.f32 %v1752_v10, %v1690_v20  ;;  %v4577_v59 = vsel %vm4576_vm15, %v2592_v21, 0.0  ;;  %v2181_v10 = vunpack.c.l.bf16 %v2264_v55  ;;  %v3594_v15 = vadd.f32 %v3514_v39, %v882_v19  ;;  %v4580_v20 = vld [vmem:[#allocation5_spill] sm:$0xff] }
 0x137   : > { %vm3536_vm14 = vmand %vm3478_vm5, %vm1532_vm8  ;;  %v3597_v21 = vmax.f32 %v2225_v38, %v3520_v5  ;;  %v1444_v23 = vadd.s32 216, %v2494_v50  ;;  %vm4579_vm5 = vnez %v4578_v52  ;;  %vm1262_vm10 = vcmp.gt.f32.partialorder %v3517_v28, %v3523_v13  ;;  %v4584_v52 = vld [vmem:[#allocation7_spill] sm:$0xff] }
 0x138   : > { %v4571_v6 = vsel %vm3536_vm14, 4294967295, %v4570_v6  ;;  %vm3551_vm11 = vmand %vm3491_vm9, %vm1509_vm3  ;;  %v1754_v31 = vadd.f32 %v1753_v33, %v4575_v30  ;;  %v4581_v33 = vsel %vm4579_vm5, %v4580_v20, 0.0  ;;  %vm1326_vm8 = vcmp.gt.f32.partialorder %v3523_v13, 0.0 }
 0x139   : > { %v927_v35 = vadd.f32 %v3514_v39, %v859_v44  ;;  %v1123_v19 = vmax.f32 %v2178_v49, %v3520_v5  ;;  %v3611_v38 = vmul.f32 %v1198_v8, %v1198_v8  ;;  %v928_v11 = vadd.f32 %v3514_v39, %v860_v17  ;;  %v2265_v8 = vld [vmem:[%s2474_s26 + $0x78] sm:$0xff]  }
 0x13a   : > { %v1755_v25 = vadd.f32 %v1754_v31, %v4577_v59  ;;  %v3614_v31 = vadd.f32 %v3514_v39, %v871_v9  ;;  %v3617_v59 = vmax.f32 %v2202_v24, %v3520_v5  ;;  %v1124_v1 = vmax.f32 %v2181_v10, %v3520_v5 }
 0x13b   : > { %v861_v44 = vmul.f32 %v3451_v29, %v3400_v62  ;;  %v2182_v49 = vunpack.c.h.bf16 %v2264_v55  ;;  %v3630_v9 = vsub.f32 %v3594_v15, %v3597_v21  ;;  %v3634_v24 = vadd.s32 312, %v2494_v50  ;;  %v4590_v62 = vld [vmem:[#allocation17_spill] sm:$0xff] }
 0x13c   : > { %v1756_v30 = vadd.f32 %v1755_v25, %v4581_v33  ;;  %v4582_v25 = vld [vmem:[#allocation8_spill] sm:$0xff]  ;;  %v1187_v10 = vsub.f32 %v927_v35, %v1123_v19  ;;  %v883_v55 = vmul.f32 %v3451_v29, %v4590_v62  ;;  %v1199_v63 = vsub.f32 %v3614_v31, %v3617_v59  ;;  %v3652_v62 = vpop.f32.mrf.mxu2 }
 0x13d   : > { %vm4583_vm3 = vnez %v4582_v25  ;;  %v4586_v25 = vld [vmem:[#allocation11_spill] sm:$0xff]  ;;  %vm4592_vm4 = vnez %v4591_v32  ;;  %v1125_v22 = vmax.f32 %v2182_v49, %v3520_v5  ;;  %vm4596_vm5 = vnez %v4595_v7  ;;  %v4597_v32 = vld [vmem:[#allocation20_spill] sm:$0xff] }
 0x13e   : > { %v4585_v20 = vsel %vm4583_vm3, %v4584_v52, 0.0  ;;  %vm4587_vm15 = vnez %v4586_v25  ;;  %vm1315_vm3 = vcmp.gt.f32.partialorder %v1123_v19, 0.0  ;;  %v4594_v3 = vsel %vm4592_vm4, %v4593_v53, 0.0  ;;  %vm3667_vm4 = vmor %vm1262_vm10, %vm1326_vm8  ;;  %v4601_v7 = vld [vmem:[#allocation23_spill] sm:$0xff] }
 0x13f   : > { %v1757_v33 = vadd.f32 %v1756_v30, %v4585_v20  ;;  %v4588_v30 = vld [vmem:[#allocation12_spill] sm:$0xff]  ;;  %v745_v20 = vpop.f32.mrf.mxu1  ;;  %v862_v25 = vmul.f32 %v3451_v29, %v743_v40  ;;  %v4598_v53 = vsel %vm4596_vm5, %v4597_v32, 0.0  ;;  %v1638_v49 = vmul.f32 %v1187_v10, %v1187_v10 }
 0x140   : > { %v4589_v17 = vsel %vm4587_vm15, %v4588_v30, 0.0  ;;  %v2185_v30 = vunpack.c.l.bf16 %v2265_v8  ;;  %v863_v40 = vmul.f32 %v3451_v29, %v745_v20  ;;  %v3676_v20 = vpop.f32.mrf.mxu3  ;;  %vm4602_vm5 = vcmp.gt.f32.partialorder %v927_v35, %v1123_v19 }
 0x141   : > { %v1758_v52 = vadd.f32 %v1757_v33, %v4589_v17  ;;  %v1445_v33 = vadd.s32 224, %v2494_v50  ;;  %v929_v17 = vadd.f32 %v3514_v39, %v861_v44  ;;  %vm3680_vm14 = vmor %vm4602_vm5, %vm1315_vm3  ;;  %v1188_v28 = vsub.f32 %v928_v11, %v1124_v1 }
 0x142   : > { %v4605_v13 = vsel %vm3314_vm7, %v3046_v12, 0.0  ;;  %v930_v32 = vadd.f32 %v3514_v39, %v862_v25  ;;  %vm4606_vm8 = vcmp.gt.f32.partialorder %v1124_v1, 0.0  ;;  %vm4607_vm15 = vcmp.gt.f32.partialorder %v928_v11, %v1124_v1 }
 0x143   : > { %v1759_v4 = vadd.f32 %v1758_v52, %v4594_v3  ;;  %v2186_v52 = vunpack.c.h.bf16 %v2265_v8  ;;  %vm3694_vm9 = vmor %vm4607_vm15, %vm4606_vm8  ;;  %vm1511_vm3 = vcmp.lt.s32.totalorder %v1445_v33, %v2496_v51  ;;  %v2205_v19 = vunpack.c.l.bf16 %v3655_v2 }
 0x144   : > { %vm4610_vm7 = vcmp.lt.s32.totalorder %v3567_v16, %v2496_v51  ;;  %vm1317_vm15 = vcmp.gt.f32.partialorder %v1125_v22, 0.0  ;;  %v4613_v1 = vsel %vm3352_vm13, %v3109_v60, 0.0  ;;  %v931_v25 = vadd.f32 %v3514_v39, %v863_v40  ;;  %vm3731_vm13 = vmand %vm3694_vm9, %vm1511_vm3  ;;  %v2276_v16 = vld [vmem:[%s2474_s26 + $0xd0] sm:$0xff]  }
 0x145   : > { %v1760_v3 = vadd.f32 %v1759_v4, %v4598_v53  ;;  %v872_v4 = vmul.f32 %v3451_v29, %v4601_v7  ;;  %v1126_v53 = vmax.f32 %v2185_v30, %v3520_v5  ;;  %vm3706_vm10 = vmand %vm3667_vm4, %vm4610_vm7  ;;  %v1127_v30 = vmax.f32 %v2186_v52, %v3520_v5 }
 0x146   : > { %vm4614_vm8 = vcmp.lt.s32.totalorder %v1444_v23, %v2496_v51  ;;  %v3725_v33 = vadd.f32 %v3514_v39, %v883_v55  ;;  %v2226_v42 = vunpack.c.h.bf16 %v3497_v26  ;;  %v1447_v60 = vadd.s32 240, %v2494_v50 }
 0x147   : > { %v1761_v10 = vadd.f32 %v1760_v3, %v4605_v13  ;;  %vm3720_vm5 = vmand %vm3680_vm14, %vm4614_vm8  ;;  %v1189_v3 = vsub.f32 %v929_v17, %v1125_v22  ;;  %v1639_v23 = vmul.f32 %v1188_v28, %v1188_v28  ;;  %v4619_v52 = vsel %vm3435_vm12, %v3474_v58, 0.0 }
 0x148   : > { %vm1254_vm14 = vcmp.gt.f32.partialorder %v930_v32, %v1126_v53  ;;  %vm1318_vm4 = vcmp.gt.f32.partialorder %v1126_v53, 0.0  ;;  %v940_v55 = vadd.f32 %v3514_v39, %v872_v4  ;;  %vm4620_vm7 = vcmp.gt.f32.partialorder %v929_v17, %v1125_v22 }
 0x149   : > { %v1762_v11 = vadd.f32 %v1761_v10, %v4613_v1  ;;  %vm3742_vm8 = vmor %vm4620_vm7, %vm1317_vm15  ;;  %v1190_v7 = vsub.f32 %v930_v32, %v1126_v53  ;;  %v1448_v8 = vadd.s32 248, %v2494_v50  ;;  %vm4623_vm3 = vcmp.gt.f32.partialorder %v3617_v59, 0.0  ;;  %v4633_v53 = vld [vmem:[#allocation25_spill] sm:$0xff]  ;;  %v4646_v1 = vld [vmem:[#allocation24_spill] sm:$0xff] }
 0x14a   : > { %vm4624_vm12 = vcmp.gt.f32.partialorder %v3614_v31, %v3617_v59  ;;  %v1136_v58 = vmax.f32 %v2205_v19, %v3520_v5  ;;  %v4627_v22 = vsel %vm3551_vm11, %v3542_v61, 0.0  ;;  %vm1255_vm15 = vcmp.gt.f32.partialorder %v931_v25, %v1127_v30  ;;  %vm3764_vm9 = vmor %vm1254_vm14, %vm1318_vm4  ;;  %v3769_v59 = vpop.f32.mrf.mxu2 }
 0x14b   : > { %v1763_v44 = vadd.f32 %v1762_v11, %v4619_v52  ;;  %vm3753_vm0 = vmor %vm4624_vm12, %vm4623_vm3  ;;  %vm1319_vm7 = vcmp.gt.f32.partialorder %v1127_v30, 0.0  ;;  %v1702_v4 = vsel %vm3720_vm5, %v1638_v49, 0.0  ;;  %v1640_v28 = vmul.f32 %v1189_v3, %v1189_v3  ;;  %v2273_v52 = vld [vmem:[%s2474_s26 + $0xb8] sm:$0xff]  }
 0x14c   : > { %vm1513_vm3 = vcmp.lt.s32.totalorder %v1447_v60, %v2496_v51  ;;  %v1191_v31 = vsub.f32 %v931_v25, %v1127_v30  ;;  %v3771_v48 = vmul.f32 %v1199_v63, %v1199_v63  ;;  %v1703_v61 = vsel %vm3731_vm13, %v1639_v23, 0.0  ;;  %vm3789_vm13 = vmor %vm1255_vm15, %vm1319_vm7 }
 0x14d   : > { %v1764_v17 = vadd.f32 %v1763_v44, %v4627_v22  ;;  %v1457_v10 = vadd.s32 320, %v2494_v50  ;;  %vm4630_vm11 = vcmp.lt.s32.totalorder %v1446_v36, %v2496_v51  ;;  %v873_v35 = vmul.f32 %v3451_v29, %v4633_v53  ;;  %v3794_v36 = vpop.f32.mrf.mxu3  ;;  %vm3804_vm12 = vmand %vm3764_vm9, %vm1513_vm3 }
 0x14e   : > { %vm3780_vm5 = vmand %vm3742_vm8, %vm4630_vm11  ;;  %v2206_v63 = vunpack.c.h.bf16 %v3655_v2  ;;  %v1641_v19 = vmul.f32 %v1190_v7, %v1190_v7  ;;  %vm1514_vm14 = vcmp.lt.s32.totalorder %v1448_v8, %v2496_v51  ;;  %v3797_v11 = vmax.f32 %v2226_v42, %v3520_v5  ;;  %v4641_v42 = vld [vmem:[#allocation22_spill] sm:$0xff] }
 0x14f   : > { %v1765_v32 = vadd.f32 %v1764_v17, %v1702_v4  ;;  %vm1264_vm4 = vcmp.gt.f32.partialorder %v940_v55, %v1136_v58  ;;  %vm1328_vm8 = vcmp.gt.f32.partialorder %v1136_v58, 0.0  ;;  %vm4638_vm15 = vcmp.lt.s32.totalorder %v3634_v24, %v2496_v51  ;;  %vm3832_vm9 = vmand %vm3789_vm13, %vm1514_vm14  ;;  %v2271_v4 = vld [vmem:[%s2474_s26 + $0xa8] sm:$0xff]  }
 0x150   : > { %vm3813_vm7 = vmand %vm3753_vm0, %vm4638_vm15  ;;  %v1200_v30 = vsub.f32 %v940_v55, %v1136_v58  ;;  %v884_v60 = vmul.f32 %v3451_v29, %v4641_v42  ;;  %v1704_v40 = vsel %vm3780_vm5, %v1640_v28, 0.0  ;;  %v1642_v23 = vmul.f32 %v1191_v31, %v1191_v31 }
 0x151   : > { %v1766_v3 = vadd.f32 %v1765_v32, %v1703_v61  ;;  %v3825_v24 = vadd.s32 400, %v2494_v50  ;;  %vm1523_vm0 = vcmp.lt.s32.totalorder %v1457_v10, %v2496_v51  ;;  %vm1392_vm3 = vmor %vm1264_vm4, %vm1328_vm8  ;;  %v2229_v7 = vunpack.c.l.bf16 %v2276_v16 }
 0x152   : > { %v941_v47 = vadd.f32 %v3514_v39, %v873_v35  ;;  %v1137_v22 = vmax.f32 %v2206_v63, %v3520_v5  ;;  %v1705_v17 = vsel %vm3804_vm12, %v1641_v19, 0.0  ;;  %v3844_v8 = vmul.f32 %v3630_v9, %v3630_v9  ;;  %vm3863_vm11 = vmand %vm1392_vm3, %vm1523_vm0  ;;  %v783_v10 = vpop.f32.mrf.mxu2 }
 0x153   : > { %v1767_v44 = vadd.f32 %v1766_v3, %v1704_v40  ;;  %v1211_v28 = vsub.f32 %v3725_v33, %v3797_v11  ;;  %v3849_v13 = vadd.s32 408, %v2494_v50  ;;  %v3854_v31 = vmul.f32 %v1200_v30, %v1200_v30  ;;  %v4649_v40 = vld [vmem:[#allocation9_spill] sm:$0xff] }
 0x154   : > { %v3857_v61 = vadd.f32 %v3514_v39, %v884_v60  ;;  %v1706_v9 = vsel %vm3832_vm9, %v1642_v23, 0.0  ;;  %v1458_v32 = vadd.s32 328, %v2494_v50  ;;  %v874_v53 = vmul.f32 %v3451_v29, %v3428_v14  ;;  %v4647_v60 = vld [vmem:[#allocation10_spill] sm:$0xff] }
 0x155   : > { %v1768_v55 = vadd.f32 %v1767_v44, %v1705_v17  ;;  %v2209_v35 = vunpack.c.l.bf16 %v2271_v4  ;;  %v3871_v19 = vmax.f32 %v2229_v7, %v3520_v5  ;;  %vm1265_vm5 = vcmp.gt.f32.partialorder %v941_v47, %v1137_v22  ;;  %v2272_v44 = vld [vmem:[%s2474_s26 + $0xb0] sm:$0xff]  }
 0x156   : > { %vm1329_vm13 = vcmp.gt.f32.partialorder %v1137_v22, 0.0  ;;  %v885_v3 = vmul.f32 %v3451_v29, %v4646_v1  ;;  %v3875_v2 = vmul.f32 %v1211_v28, %v1211_v28  ;;  %v1201_v30 = vsub.f32 %v941_v47, %v1137_v22  ;;  %v3893_v28 = vpop.f32.mrf.mxu3  ;;  %v3905_v1 = vld [vmem:[%s2474_s26 + $0xd8] sm:$0xff]  }
 0x157   : > { %v1769_v63 = vadd.f32 %v1768_v55, %v1706_v9  ;;  %v2230_v42 = vunpack.c.h.bf16 %v2276_v16  ;;  %vm4648_vm14 = vnez %v4647_v60  ;;  %vm1274_vm4 = vcmp.gt.f32.partialorder %v3594_v15, %v3597_v21  ;;  %4651 = vst [vmem:[#allocation6_spill] sm:$0xff] %v3893_v28  ;;  %vm3897_vm12 = vmor %vm1265_vm5, %vm1329_vm13  ;;  %v4654_v60 = vld [vmem:[#allocation14_spill] sm:$0xff] }
 0x158   : > { %v4650_v14 = vsel %vm4648_vm14, %v4649_v40, 0.0  ;;  %vm1338_vm8 = vcmp.gt.f32.partialorder %v3597_v21, 0.0  ;;  %v3889_v7 = vadd.s32 416, %v2494_v50  ;;  %v875_v16 = vmul.f32 %v3451_v29, %v3572_v27  ;;  %v4656_v27 = vld [vmem:[#allocation13_spill] sm:$0xff] }
 0x159   : > { %v1770_v23 = vadd.f32 %v1769_v63, %v4650_v14  ;;  %v2210_v17 = vunpack.c.h.bf16 %v2271_v4  ;;  %vm1524_vm15 = vcmp.lt.s32.totalorder %v1458_v32, %v2496_v51  ;;  %v942_v9 = vadd.f32 %v3514_v39, %v874_v53 }
 0x15a   : > { %v1138_v63 = vmax.f32 %v2209_v35, %v3520_v5  ;;  %vm4655_vm0 = vnez %v4654_v60  ;;  %v3913_v47 = vsub.f32 %v3857_v61, %v3871_v19  ;;  %v3916_v22 = vadd.f32 %v3514_v39, %v885_v3  ;;  %vm3937_vm13 = vmand %vm3897_vm12, %vm1524_vm15 }
 0x15b   : > { %v4657_v4 = vsel %vm4655_vm0, %v4656_v27, 0.0  ;;  %v876_v14 = vmul.f32 %v3451_v29, %v3652_v62  ;;  %v2213_v53 = vunpack.c.l.bf16 %v2272_v44  ;;  %v3920_v26 = vmul.f32 %v1201_v30, %v1201_v30  ;;  %v4658_v27 = vld [vmem:[#allocation19_spill] sm:$0xff] }
 0x15c   : > { %v1771_v40 = vadd.f32 %v1770_v23, %v4657_v4  ;;  %v3923_v35 = vmax.f32 %v2230_v42, %v3520_v5  ;;  %v1459_v60 = vadd.s32 336, %v2494_v50  ;;  %vm4659_vm9 = vnez %v4658_v27  ;;  %v4660_v23 = vld [vmem:[#allocation18_spill] sm:$0xff] }
 0x15d   : > { %v4661_v4 = vsel %vm4659_vm9, %v4660_v23, 0.0  ;;  %vm1275_vm3 = vcmp.gt.f32.partialorder %v3725_v33, %v3797_v11  ;;  %vm1339_vm5 = vcmp.gt.f32.partialorder %v3797_v11, 0.0  ;;  %v886_v3 = vmul.f32 %v3451_v29, %v3292_v54 }
 0x15e   : > { %v1772_v58 = vadd.f32 %v1771_v40, %v4661_v4  ;;  %v2233_v30 = vunpack.c.l.bf16 %v3905_v1  ;;  %v943_v42 = vadd.f32 %v3514_v39, %v875_v16  ;;  %v1139_v40 = vmax.f32 %v2210_v17, %v3520_v5 }
 0x15f   : > { %v3947_v27 = vadd.s32 424, %v2494_v50  ;;  %vm1266_vm14 = vcmp.gt.f32.partialorder %v942_v9, %v1138_v63  ;;  %vm1330_vm0 = vcmp.gt.f32.partialorder %v1138_v63, 0.0  ;;  %v4664_v32 = vsel %vm3330_vm2, %v3048_v18, 0.0 }
 0x160   : > { %v1773_v55 = vadd.f32 %v1772_v58, %v4664_v32  ;;  %v944_v23 = vadd.f32 %v3514_v39, %v876_v14  ;;  %v1140_v54 = vmax.f32 %v2213_v53, %v3520_v5  ;;  %v877_v4 = vmul.f32 %v3451_v29, %v3769_v59 }
 0x161   : > { %v2214_v16 = vunpack.c.h.bf16 %v2272_v44  ;;  %v1716_v17 = vsel %vm3937_vm13, %v3920_v26, 0.0  ;;  %v1202_v28 = vsub.f32 %v942_v9, %v1138_v63  ;;  %vm1525_vm12 = vcmp.lt.s32.totalorder %v1459_v60, %v2496_v51  ;;  %v785_v26 = vpop.f32.mrf.mxu2  ;;  %vm3978_vm13 = vmor %vm1266_vm14, %vm1330_vm0 }
 0x162   : > { %v4665_v18 = vsel %vm3370_vm1, %v3105_v0, 0.0  ;;  %v3970_v59 = vadd.f32 %v3514_v39, %v886_v3  ;;  %v3973_v58 = vmax.f32 %v2233_v30, %v3520_v5  ;;  %vm1267_vm9 = vcmp.gt.f32.partialorder %v943_v42, %v1139_v40  ;;  %v3992_v30 = vpop.f32.mrf.mxu3  ;;  %vm4012_vm0 = vmand %vm3978_vm13, %vm1525_vm12 }
 0x163   : > { %v1774_v45 = vadd.f32 %v1773_v55, %v4665_v18  ;;  %v1460_v44 = vadd.s32 344, %v2494_v50  ;;  %vm1331_vm1 = vcmp.gt.f32.partialorder %v1139_v40, 0.0  ;;  %v4668_v34 = vsel %vm3509_vm6, %v3487_v46, 0.0  ;;  %vm3999_vm6 = vmor %vm1274_vm4, %vm1338_vm8 }
 0x164   : > { %v878_v53 = vmul.f32 %v3451_v29, %v783_v10  ;;  %v2217_v62 = vunpack.c.l.bf16 %v2273_v52  ;;  %vm1533_vm2 = vcmp.lt.s32.totalorder %v3825_v24, %v2496_v51  ;;  %vm1268_vm15 = vcmp.gt.f32.partialorder %v944_v23, %v1140_v54  ;;  %vm4023_vm8 = vmor %vm1267_vm9, %vm1331_vm1 }
 0x165   : > { %v1775_v14 = vadd.f32 %v1774_v45, %v4668_v34  ;;  %v1461_v3 = vadd.s32 352, %v2494_v50  ;;  %v945_v9 = vadd.f32 %v3514_v39, %v877_v4  ;;  %v1141_v63 = vmax.f32 %v2214_v16, %v3520_v5 }
 0x166   : > { %v4671_v57 = vsel %vm3706_vm10, %v3611_v38, 0.0  ;;  %vm1332_vm14 = vcmp.gt.f32.partialorder %v1140_v54, 0.0  ;;  %v879_v32 = vmul.f32 %v3451_v29, %v785_v26  ;;  %v2218_v55 = vunpack.c.h.bf16 %v2273_v52 }
 0x167   : > { %v1776_v10 = vadd.f32 %v1775_v14, %v4671_v57  ;;  %v1653_v15 = vmul.f32 %v1202_v28, %v1202_v28  ;;  %v1203_v21 = vsub.f32 %v943_v42, %v1139_v40  ;;  %vm1526_vm4 = vcmp.lt.s32.totalorder %v1460_v44, %v2496_v51  ;;  %vm4036_vm12 = vmor %vm1268_vm15, %vm1332_vm14  ;;  %v2278_v14 = vld [vmem:[%s2474_s26 + $0xe0] sm:$0xff]  }
 0x168   : > { %v887_v38 = vmul.f32 %v3451_v29, %v3457_v56  ;;  %v4676_v52 = vsel %vm3813_vm7, %v3771_v48, 0.0  ;;  %v1204_v60 = vsub.f32 %v944_v23, %v1140_v54  ;;  %v946_v16 = vadd.f32 %v3514_v39, %v878_v53  ;;  %vm4047_vm7 = vmor %vm1275_vm3, %vm1339_vm5 }
 0x169   : > { %v1777_v28 = vadd.f32 %v1776_v10, %v4676_v52  ;;  %v1142_v18 = vmax.f32 %v2217_v62, %v3520_v5  ;;  %v2234_v56 = vunpack.c.h.bf16 %v3905_v1  ;;  %vm1527_vm9 = vcmp.lt.s32.totalorder %v1461_v3, %v2496_v51  ;;  %vm4067_vm5 = vmand %vm4023_vm8, %vm1526_vm4 }
 0x16a   : > { %vm1269_vm13 = vcmp.gt.f32.partialorder %v945_v9, %v1141_v63  ;;  %v1462_v25 = vadd.s32 360, %v2494_v50  ;;  %v4681_v1 = vsel %vm3863_vm11, %v3854_v31, 0.0  ;;  %vm1333_vm1 = vcmp.gt.f32.partialorder %v1141_v63, 0.0  ;;  %vm4076_vm11 = vmand %vm4036_vm12, %vm1527_vm9 }
 0x16b   : > { %v1778_v40 = vadd.f32 %v1777_v28, %v4681_v1  ;;  %v947_v23 = vadd.f32 %v3514_v39, %v879_v32  ;;  %v1143_v54 = vmax.f32 %v2218_v55, %v3520_v5  ;;  %v1717_v33 = vsel %vm4012_vm0, %v1653_v15, 0.0  ;;  %vm4084_vm4 = vmor %vm1269_vm13, %vm1333_vm1 }
 0x16c   : > { %v1654_v31 = vmul.f32 %v1203_v21, %v1203_v21  ;;  %v1205_v49 = vsub.f32 %v945_v9, %v1141_v63  ;;  %v1463_v45 = vadd.s32 368, %v2494_v50  ;;  %v1655_v44 = vmul.f32 %v1204_v60, %v1204_v60 }
 0x16d   : > { %v1779_v26 = vadd.f32 %v1778_v40, %v1716_v17  ;;  %vm1270_vm14 = vcmp.gt.f32.partialorder %v946_v16, %v1142_v18  ;;  %vm1334_vm0 = vcmp.gt.f32.partialorder %v1142_v18, 0.0  ;;  %v955_v34 = vadd.f32 %v3514_v39, %v887_v38  ;;  %v2281_v40 = vld [vmem:[%s2474_s26 + $0xf8] sm:$0xff]  }
 0x16e   : > { %vm1528_vm8 = vcmp.lt.s32.totalorder %v1462_v25, %v2496_v51  ;;  %v1206_v17 = vsub.f32 %v946_v16, %v1142_v18  ;;  %v1464_v62 = vadd.s32 376, %v2494_v50  ;;  %vm4688_vm12 = vcmp.gt.f32.partialorder %v3871_v19, 0.0  ;;  %vm4103_vm15 = vmor %vm1270_vm14, %vm1334_vm0 }
 0x16f   : > { %vm4689_vm9 = vcmp.gt.f32.partialorder %v3857_v61, %v3871_v19  ;;  %v1780_v57 = vadd.f32 %v1779_v26, %v1717_v33  ;;  %v1151_v9 = vmax.f32 %v2234_v56, %v3520_v5  ;;  %vm1271_vm13 = vcmp.gt.f32.partialorder %v947_v23, %v1143_v54  ;;  %v4108_v19 = vpop.f32.mrf.mxu3 }
 0x170   : > { %vm4095_vm3 = vmor %vm4689_vm9, %vm4688_vm12  ;;  %vm1335_vm1 = vcmp.gt.f32.partialorder %v1143_v54, 0.0  ;;  %v1718_v63 = vsel %vm4067_vm5, %v1654_v31, 0.0  ;;  %v1656_v10 = vmul.f32 %v1205_v49, %v1205_v49  ;;  %vm1529_vm10 = vcmp.lt.s32.totalorder %v1463_v45, %v2496_v51 }
 0x171   : > { %v1207_v61 = vsub.f32 %v947_v23, %v1143_v54  ;;  %vm4115_vm12 = vmand %vm3999_vm6, %vm1533_vm2  ;;  %v1781_v4 = vadd.f32 %v1780_v57, %v1718_v63  ;;  %v1719_v15 = vsel %vm4076_vm11, %v1655_v44, 0.0  ;;  %v888_v21 = vmul.f32 %v3451_v29, %v3591_v41 }
 0x172   : > { %v2237_v38 = vunpack.c.l.bf16 %v2278_v14  ;;  %vm4127_vm5 = vmand %vm4084_vm4, %vm1528_vm8  ;;  %v889_v46 = vmul.f32 %v3451_v29, %v3676_v20  ;;  %v2238_v12 = vunpack.c.h.bf16 %v2278_v14  ;;  %v1657_v52 = vmul.f32 %v1206_v17, %v1206_v17 }
 0x173   : > { %vm4135_vm2 = vmor %vm1271_vm13, %vm1335_vm1  ;;  %vm1530_vm6 = vcmp.lt.s32.totalorder %v1464_v62, %v2496_v51  ;;  %vm1341_vm11 = vcmp.gt.f32.partialorder %v3923_v35, 0.0  ;;  %vm1278_vm14 = vcmp.gt.f32.partialorder %v3970_v59, %v3973_v58  ;;  %v1471_v41 = vadd.s32 432, %v2494_v50 }
 0x174   : > { %v1782_v60 = vadd.f32 %v1781_v4, %v1719_v15  ;;  %vm4148_vm0 = vmand %vm4103_vm15, %vm1529_vm10  ;;  %vm4702_vm4 = vcmp.lt.s32.totalorder %v3849_v13, %v2496_v51  ;;  %vm1342_vm9 = vcmp.gt.f32.partialorder %v3973_v58, 0.0  ;;  %v1472_v18 = vadd.s32 440, %v2494_v50  ;;  %v4728_v15 = vld [vmem:[#allocation6_spill] sm:$0xff] }
 0x175   : > { %vm4157_vm8 = vmand %vm4047_vm7, %vm4702_vm4  ;;  %v1720_v56 = vsel %vm4127_vm5, %v1656_v10, 0.0  ;;  %v1658_v42 = vmul.f32 %v1207_v61, %v1207_v61  ;;  %vm1279_vm10 = vcmp.gt.f32.partialorder %v955_v34, %v1151_v9  ;;  %v956_v25 = vadd.f32 %v3514_v39, %v888_v21  ;;  %v2280_v61 = vld [vmem:[%s2474_s26 + $0xf0] sm:$0xff]  }
 0x176   : > { %v1152_v1 = vmax.f32 %v2237_v38, %v3520_v5  ;;  %v1783_v13 = vadd.f32 %v1782_v60, %v1720_v56  ;;  %vm4171_vm7 = vmand %vm4135_vm2, %vm1530_vm6  ;;  %vm4707_vm15 = vcmp.lt.s32.totalorder %v3889_v7, %v2496_v51  ;;  %vm1343_vm1 = vcmp.gt.f32.partialorder %v1151_v9, 0.0 }
 0x177   : > { %vm4180_vm13 = vmand %vm4095_vm3, %vm4707_vm15  ;;  %v957_v23 = vadd.f32 %v3514_v39, %v889_v46  ;;  %v1153_v54 = vmax.f32 %v2238_v12, %v3520_v5  ;;  %v1721_v33 = vsel %vm4148_vm0, %v1657_v52, 0.0  ;;  %v4190_v11 = vmul.f32 %v3913_v47, %v3913_v47 }
 0x178   : > { %v1213_v7 = vsub.f32 %v3916_v22, %v3923_v35  ;;  %vm4710_vm3 = vcmp.gt.f32.partialorder %v3916_v22, %v3923_v35  ;;  %vm1536_vm2 = vcmp.lt.s32.totalorder %v3947_v27, %v2496_v51  ;;  %v1784_v31 = vadd.f32 %v1783_v13, %v1721_v33  ;;  %vm4208_vm6 = vmor %vm1278_vm14, %vm1342_vm9  ;;  %v2279_v35 = vld [vmem:[%s2474_s26 + $0xe8] sm:$0xff]  }
 0x179   : > { %vm1405_vm5 = vmor %vm4710_vm3, %vm1341_vm11  ;;  %v1214_v49 = vsub.f32 %v3970_v59, %v3973_v58  ;;  %vm1537_vm0 = vcmp.lt.s32.totalorder %v1471_v41, %v2496_v51  ;;  %v1215_v22 = vsub.f32 %v955_v34, %v1151_v9  ;;  %v1722_v27 = vsel %vm4171_vm7, %v1658_v42, 0.0  ;;  %v823_v34 = vpop.f32.mrf.mxu3 }
 0x17a   : > { %vm4218_vm11 = vmor %vm1279_vm10, %vm1343_vm1  ;;  %vm1538_vm4 = vcmp.lt.s32.totalorder %v1472_v18, %v2496_v51  ;;  %v1216_v59 = vsub.f32 %v956_v25, %v1152_v1  ;;  %v1473_v58 = vadd.s32 448, %v2494_v50  ;;  %v1785_v26 = vadd.f32 %v1784_v31, %v1722_v27 }
 0x17b   : > { %vm4224_vm14 = vmand %vm1405_vm5, %vm1536_vm2  ;;  %vm1280_vm9 = vcmp.gt.f32.partialorder %v956_v25, %v1152_v1  ;;  %vm1344_vm15 = vcmp.gt.f32.partialorder %v1152_v1, 0.0  ;;  %vm1281_vm3 = vcmp.gt.f32.partialorder %v957_v23, %v1153_v54  ;;  %v1474_v44 = vadd.s32 456, %v2494_v50 }
 0x17c   : > { %vm4233_vm10 = vmand %vm4208_vm6, %vm1537_vm0  ;;  %vm1345_vm7 = vcmp.gt.f32.partialorder %v1153_v54, 0.0  ;;  %v890_v53 = vmul.f32 %v3451_v29, %v3794_v36  ;;  %v2241_v17 = vunpack.c.l.bf16 %v2279_v35  ;;  %vm4719_vm1 = vnez %v4553_v37 }
 0x17d   : > { %v4720_v62 = vsel %vm4719_vm1, %v3161_v43, 0.0  ;;  %v1725_v57 = vsel %vm4115_vm12, %v3844_v8, 0.0  ;;  %v1726_v9 = vsel %vm4157_vm8, %v3875_v2, 0.0  ;;  %v1664_v63 = vmul.f32 %v1213_v7, %v1213_v7  ;;  %vm4253_vm5 = vmand %vm4218_vm11, %vm1538_vm4  ;;  %v4724_v8 = vld [vmem:[#allocation26_spill] sm:$0xff] }
 0x17e   : > { %v1786_v3 = vadd.f32 %v1785_v26, %v4720_v62  ;;  %v1217_v37 = vsub.f32 %v957_v23, %v1153_v54  ;;  %v1665_v43 = vmul.f32 %v1214_v49, %v1214_v49  ;;  %v1666_v10 = vmul.f32 %v1215_v22, %v1215_v22  ;;  %vm1408_vm2 = vmor %vm1280_vm9, %vm1344_vm15 }
 0x17f   : > { %vm1539_vm12 = vcmp.lt.s32.totalorder %v1473_v58, %v2496_v51  ;;  %vm4723_vm6 = vnez %v4571_v6  ;;  %v1727_v55 = vsel %vm4180_vm13, %v4190_v11, 0.0  ;;  %vm4270_vm8 = vmor %vm1281_vm3, %vm1345_vm7  ;;  %vm1540_vm0 = vcmp.lt.s32.totalorder %v1474_v44, %v2496_v51 }
 0x180   : > { %v4725_v2 = vsel %vm4723_vm6, %v4724_v8, 0.0  ;;  %v891_v21 = vmul.f32 %v3451_v29, %v4728_v15  ;;  %v2242_v6 = vunpack.c.h.bf16 %v2279_v35  ;;  %v1667_v38 = vmul.f32 %v1216_v59, %v1216_v59  ;;  %vm4281_vm13 = vmand %vm1408_vm2, %vm1539_vm12 }
 0x181   : > { %v1787_v32 = vadd.f32 %v1786_v3, %v4725_v2  ;;  %v958_v24 = vadd.f32 %v3514_v39, %v890_v53  ;;  %v1154_v46 = vmax.f32 %v2241_v17, %v3520_v5  ;;  %v1728_v52 = vsel %vm4224_vm14, %v1664_v63, 0.0  ;;  %vm4293_vm11 = vmand %vm4270_vm8, %vm1540_vm0  ;;  %v825_v49 = vpop.f32.mrf.mxu3 }
 0x182   : > { %v1668_v41 = vmul.f32 %v1217_v37, %v1217_v37  ;;  %v892_v60 = vmul.f32 %v3451_v29, %v3992_v30  ;;  %v2245_v20 = vunpack.c.l.bf16 %v2280_v61  ;;  %v1729_v16 = vsel %vm4233_vm10, %v1665_v43, 0.0 }
 0x183   : > { %v1788_v12 = vadd.f32 %v1787_v32, %v1725_v57  ;;  %v1730_v18 = vsel %vm4253_vm5, %v1666_v10, 0.0  ;;  %v1475_v42 = vadd.s32 464, %v2494_v50  ;;  %v959_v1 = vadd.f32 %v3514_v39, %v891_v21 }
 0x184   : > { %v1155_v30 = vmax.f32 %v2242_v6, %v3520_v5  ;;  %v893_v13 = vmul.f32 %v3451_v29, %v4108_v19  ;;  %v2246_v48 = vunpack.c.h.bf16 %v2280_v61  ;;  %v1731_v23 = vsel %vm4281_vm13, %v1667_v38, 0.0 }
 0x185   : > { %v1789_v25 = vadd.f32 %v1788_v12, %v1726_v9  ;;  %vm1282_vm4 = vcmp.gt.f32.partialorder %v958_v24, %v1154_v46  ;;  %vm1346_vm14 = vcmp.gt.f32.partialorder %v1154_v46, 0.0  ;;  %v1732_v33 = vsel %vm4293_vm11, %v1668_v41, 0.0 }
 0x186   : > { %v1218_v11 = vsub.f32 %v958_v24, %v1154_v46  ;;  %v960_v7 = vadd.f32 %v3514_v39, %v892_v60  ;;  %v1156_v31 = vmax.f32 %v2245_v20, %v3520_v5  ;;  %vm1541_vm9 = vcmp.lt.s32.totalorder %v1475_v42, %v2496_v51  ;;  %vm1410_vm15 = vmor %vm1282_vm4, %vm1346_vm14 }
 0x187   : > { %v1790_v54 = vadd.f32 %v1789_v25, %v1727_v55  ;;  %v894_v47 = vmul.f32 %v3451_v29, %v823_v34  ;;  %v2249_v22 = vunpack.c.l.bf16 %v2281_v40  ;;  %vm1283_vm3 = vcmp.gt.f32.partialorder %v959_v1, %v1155_v30  ;;  %vm4318_vm1 = vmand %vm1410_vm15, %vm1541_vm9 }
 0x188   : > { %v1476_v35 = vadd.s32 472, %v2494_v50  ;;  %v961_v27 = vadd.f32 %v3514_v39, %v893_v13  ;;  %v1157_v45 = vmax.f32 %v2246_v48, %v3520_v5  ;;  %vm1347_vm10 = vcmp.gt.f32.partialorder %v1155_v30, 0.0 }
 0x189   : > { %v1791_v19 = vadd.f32 %v1790_v54, %v1728_v52  ;;  %v895_v58 = vmul.f32 %v3451_v29, %v825_v49  ;;  %v2250_v26 = vunpack.c.h.bf16 %v2281_v40  ;;  %v1669_v0 = vmul.f32 %v1218_v11, %v1218_v11  ;;  %vm4325_vm2 = vmor %vm1283_vm3, %vm1347_vm10 }
 0x18a   : > { %v1219_v44 = vsub.f32 %v959_v1, %v1155_v30  ;;  %vm1284_vm7 = vcmp.gt.f32.partialorder %v960_v7, %v1156_v31  ;;  %v1477_v14 = vadd.s32 480, %v2494_v50  ;;  %vm1348_vm5 = vcmp.gt.f32.partialorder %v1156_v31, 0.0 }
 0x18b   : > { %v1792_v59 = vadd.f32 %v1791_v19, %v1729_v16  ;;  %v962_v17 = vadd.f32 %v3514_v39, %v894_v47  ;;  %v1158_v62 = vmax.f32 %v2249_v22, %v3520_v5  ;;  %vm1542_vm12 = vcmp.lt.s32.totalorder %v1476_v35, %v2496_v51  ;;  %vm4334_vm0 = vmor %vm1284_vm7, %vm1348_vm5 }
 0x18c   : > { %v1220_v3 = vsub.f32 %v960_v7, %v1156_v31  ;;  %vm1285_vm6 = vcmp.gt.f32.partialorder %v961_v27, %v1157_v45  ;;  %v1478_v57 = vadd.s32 488, %v2494_v50  ;;  %vm1349_vm8 = vcmp.gt.f32.partialorder %v1157_v45, 0.0  ;;  %vm4344_vm11 = vmand %vm4325_vm2, %vm1542_vm12 }
 0x18d   : > { %v1793_v53 = vadd.f32 %v1792_v59, %v1730_v18  ;;  %v963_v63 = vadd.f32 %v3514_v39, %v895_v58  ;;  %v1159_v36 = vmax.f32 %v2250_v26, %v3520_v5  ;;  %v1670_v37 = vmul.f32 %v1219_v44, %v1219_v44  ;;  %vm1413_vm9 = vmor %vm1285_vm6, %vm1349_vm8 }
 0x18e   : > { %vm1543_vm13 = vcmp.lt.s32.totalorder %v1477_v14, %v2496_v51  ;;  %v1221_v10 = vsub.f32 %v961_v27, %v1157_v45  ;;  %v1479_v8 = vadd.s32 496, %v2494_v50  ;;  %v1733_v2 = vsel %vm4318_vm1, %v1669_v0, 0.0 }
 0x18f   : > { %v1794_v9 = vadd.f32 %v1793_v53, %v1731_v23  ;;  %vm1286_vm4 = vcmp.gt.f32.partialorder %v962_v17, %v1158_v62  ;;  %vm1350_vm14 = vcmp.gt.f32.partialorder %v1158_v62, 0.0  ;;  %v1671_v32 = vmul.f32 %v1220_v3, %v1220_v3  ;;  %vm1607_vm3 = vmand %vm4334_vm0, %vm1543_vm13 }
 0x190   : > { %vm1544_vm15 = vcmp.lt.s32.totalorder %v1478_v57, %v2496_v51  ;;  %v1222_v61 = vsub.f32 %v962_v17, %v1158_v62  ;;  %v1480_v55 = vadd.s32 504, %v2494_v50  ;;  %vm1287_vm10 = vcmp.gt.f32.partialorder %v963_v63, %v1159_v36  ;;  %vm1414_vm1 = vmor %vm1286_vm4, %vm1350_vm14 }
 0x191   : > { %v1795_v5 = vadd.f32 %v1794_v9, %v1732_v33  ;;  %vm1351_vm7 = vcmp.gt.f32.partialorder %v1159_v36, 0.0  ;;  %v1734_v15 = vsel %vm4344_vm11, %v1670_v37, 0.0  ;;  %v1672_v21 = vmul.f32 %v1221_v10, %v1221_v10  ;;  %vm1608_vm2 = vmand %vm1413_vm9, %vm1544_vm15 }
 0x192   : > { %vm1545_vm5 = vcmp.lt.s32.totalorder %v1479_v8, %v2496_v51  ;;  %v1223_v6 = vsub.f32 %v963_v63, %v1159_v36  ;;  %v1735_v24 = vsel %vm1607_vm3, %v1671_v32, 0.0  ;;  %v1673_v46 = vmul.f32 %v1222_v61, %v1222_v61  ;;  %vm1415_vm12 = vmor %vm1287_vm10, %vm1351_vm7 }
 0x193   : > { %v1796_v4 = vadd.f32 %v1795_v5, %v1733_v2  ;;  %vm1546_vm6 = vcmp.lt.s32.totalorder %v1480_v55, %v2496_v51  ;;  %vm1609_vm8 = vmand %vm1414_vm1, %vm1545_vm5  ;;  %v1736_v12 = vsel %vm1608_vm2, %v1672_v21, 0.0 }
 0x194   : > { %v1674_v52 = vmul.f32 %v1223_v6, %v1223_v6  ;;  %vm1610_vm0 = vmand %vm1415_vm12, %vm1546_vm6  ;;  %v1737_v41 = vsel %vm1609_vm8, %v1673_v46, 0.0 }
 0x195   : > { %v1797_v38 = vadd.f32 %v1796_v4, %v1734_v15 }
 0x196   : > { %v1738_v20 = vsel %vm1610_vm0, %v1674_v52, 0.0 }
 0x197   : > { %v1798_v50 = vadd.f32 %v1797_v38, %v1735_v24 }
 0x199   : > { %v1799_v28 = vadd.f32 %v1798_v50, %v1736_v12 }
 0x19b   : > { %v1800_v60 = vadd.f32 %v1799_v28, %v1737_v41 }
 0x19d   : > { %v1801_v16 = vadd.f32 %v1800_v60, %v1738_v20 }
 0x19f   : > { %v1802_v18 = vrot.slane %v1801_v16, 4 }
 0x1a1   : > { %v1803_v56 = vadd.f32 %v1802_v18, %v1801_v16 }
 0x1a3   : > { %v1804_v42 = vrot.slane %v1803_v56, 2 }
 0x1a5   : > { %v1805_v25 = vadd.f32 %v1804_v42, %v1803_v56 }
 0x1a7   : > { %v1806_v1 = vrot.slane %v1805_v25, 1 }
 0x1a9   : > { %v1807_v51 = vadd.f32 %v1806_v1, %v1805_v25 }
 0x1ab   : > { %1808 = vst [vmem:[%s338_s8] sm:$0x1] %v1807_v51 }
 0x1ac PF: > { %s25_s28 = sadd.s32 1, %s2341_s28  }
 0x1ad   : > { %p22_p4 = scmp.ge.s32.totalorder %s25_s28, 6  }
 0x1af   :  { %24 = sbr.rel (!%p22_p4) target bundleno = 7 (0x7), region = 89 }

</bundles_post_ra>
